<compile_context>
chip_gen: v6e
topology: v6e:2x2x1
jax: 0.10.0
libtpu: 0.0.40
codegen_flags: <defaults>
</compile_context>

<pallas_src>
import functools

import numpy as np
import jax
import jax.numpy as jnp
from jax import lax
from jax.experimental import pallas as pl
from jax.experimental.pallas import tpu as pltpu


def _round_up(a, m):
    return ((a + m - 1) // m) * m


def _device_kind():
    try:
        return jax.devices()[0].device_kind.lower()
    except Exception:
        return ""


def _vmem_capacity_bytes():
    """Physical VMEM per TensorCore (generation aware, with safe fallbacks)."""
    try:
        info = pltpu.get_tpu_info()
        cap = int(getattr(info, "vmem_capacity_bytes", 0) or 0)
        if cap > 0:
            return cap
    except Exception:
        pass
    kind = _device_kind()
    if "v7" in kind:
        return 64 << 20          # v7x: 64 MiB per TensorCore
    return 128 << 20             # v5e / v6e (and older): 128 MiB


def _has_multiple_tensorcores():
    kind = _device_kind()
    return any(t in kind for t in ("v7", "v4", "v5p", "v5 p"))


def _bf16_exp_native():
    """bf16 EUP pipe exists on v6e / v7x; v5e and older are f32-only."""
    kind = _device_kind()
    return ("v6" in kind) or ("v7" in kind)


def _auto_batch_block(bs, ht, wd, r, multi_tc, budget_bytes):
    """Largest divisor of bs whose slab working set fits the VMEM budget."""
    wp = wd + 2 * r
    hp_pad = _round_up(ht + 2 * r, 8)
    ht_pad = _round_up(ht, 8)
    best = 1
    for bb in range(1, bs + 1):
        if bs % bb:
            continue
        lp = _round_up(bb * wp, 128)
        need = 4 * (2 * bb * ht * wd        # input block (double-buffered)
                    + 2 * hp_pad * lp       # mf / working-slab block (x2)
                    + 2 * ht_pad * lp       # int32 label block (x2)
                    + 10 * hp_pad * lp)     # live values + spill headroom
        if need <= budget_bytes:
            best = bb
    if multi_tc and bs > 1:
        # Keep >= 2 grid steps so both TensorCores of a v7x / megacore chip get
        # work.  On single-TC chips (v5e/v6e) the grid is a serial loop, so we
        # keep the largest block instead.
        cap = max(bs // 2, 1)
        while best > cap or bs % best:
            best -= 1
        best = max(best, 1)
    return best


def _fused_meanshift_kernel(x_ref, *out_refs, bb, ht, wd, radius, num_iter,
                            coef, log_thr, label_div, use_bf16_exp,
                            emit_label, wp, hp, hp_pad, ht_pad, lp):
    """Fused ReLU + num_iter meanshift iterations + label rounding.

    Working layout: one padded slab per grid step, shape (hp_pad, lp), with
    each of the bb images in its own lane stripe [b*wp, (b+1)*wp).  Image
    interiors live at rows [r, r+ht) and lanes [b*wp+r, b*wp+r+wd).  The mf
    output block doubles as the slab (no extra VMEM scratch); the wrapper
    slices the interiors back out.
    """
    if emit_label:
        mf_ref, lab_ref = out_refs
    else:
        (mf_ref,) = out_refs
        lab_ref = None

    r = radius
    d = 2 * r + 1

    # Deterministic init: alignment garbage lanes/rows stay finite (zero) and
    # are never sourced by an interior pixel.
    mf_ref[...] = jnp.zeros((hp_pad, lp), jnp.float32)
    if emit_label:
        lab_ref[...] = jnp.zeros((ht_pad, lp), jnp.int32)

    # Fused nn.ReLU + scatter each image into its own lane stripe.
    relu_x = jnp.maximum(x_ref[...], 0.0)            # (bb, ht, wd)
    for b in range(bb):
        base = b * wp
        mf_ref[r:r + ht, base + r:base + r + wd] = relu_x[b]
    x0 = mf_ref[r:r + ht, :]                         # (ht, lp) current estimate

    def one_iteration(_, xc):
        # ---- rebuild replication padding from the in-register value xc ----
        mf_ref[r:r + ht, :] = xc
        if r > 0:
            # top / bottom pad rows (corners fixed per-stripe below)
            mf_ref[0:r, :] = jnp.broadcast_to(xc[0:1, :], (r, lp))
            mf_ref[r + ht:hp, :] = jnp.broadcast_to(xc[ht - 1:ht, :], (r, lp))
            for b in range(bb):
                base = b * wp
                l0, r0 = base + r, base + r + wd      # interior lane range
                lcol = xc[:, l0:l0 + 1]
                rcol = xc[:, r0 - 1:r0]
                mf_ref[r:r + ht, base:l0] = jnp.broadcast_to(lcol, (ht, r))
                mf_ref[r:r + ht, r0:base + wp] = jnp.broadcast_to(rcol, (ht, r))
                # corners (pad rows x pad cols)
                mf_ref[0:r, base:l0] = jnp.broadcast_to(
                    xc[0:1, l0:l0 + 1], (r, r))
                mf_ref[0:r, r0:base + wp] = jnp.broadcast_to(
                    xc[0:1, r0 - 1:r0], (r, r))
                mf_ref[r + ht:hp, base:l0] = jnp.broadcast_to(
                    xc[ht - 1:ht, l0:l0 + 1], (r, r))
                mf_ref[r + ht:hp, r0:base + wp] = jnp.broadcast_to(
                    xc[ht - 1:ht, r0 - 1:r0], (r, r))
        q = mf_ref[...]                               # (hp_pad, lp) padded slab

        num = jnp.zeros((ht, lp), jnp.float32)
        den = jnp.zeros((ht, lp), jnp.float32)
        # Unrolled (2r+1)^2 neighbour loop == the one-hot nei/rng convolutions.
        # One lane roll (XLU) per column offset; rows come from sublane slices.
        for kx in range(d):
            shift = (kx - r) % lp
            col = q if shift == 0 else pltpu.roll(q, shift=shift, axis=1)
            for ky in range(d):
                nbr = col[ky:ky + ht, :]
                diff = xc - nbr
                z = coef * (diff * diff)              # f32, z <= 0
                # 0.1 down-weight decision on f32 z (== e < thr); exact even
                # on the bf16-exp path, and off the EUP critical path.
                scale = jnp.where(z < log_thr, 0.1, 1.0)
                if use_bf16_exp:
                    e = jnp.exp(z.astype(jnp.bfloat16)).astype(jnp.float32)
                else:
                    e = jnp.exp(z)
                w = e * scale
                num = num + w * nbr
                den = den + w
        return num / den

    x_fin = lax.fori_loop(0, num_iter, one_iteration, x0)

    mf_ref[r:r + ht, :] = x_fin
    if emit_label:
        # labelImgs = round(mf_fea / (rradius + 0.01)).int()
        lab_ref[0:ht, :] = jnp.round(x_fin / label_div).astype(jnp.int32)


def _slice_images(slab, nb, bb, ht, wd, r, wp, row_off):
    """(nb, rows, lp) slab -> (nb*bb, ht, wd) per-image interiors."""
    s = slab[:, row_off:row_off + ht, :bb * wp]
    s = s.reshape(nb, ht, bb, wp)[:, :, :, r:r + wd]
    return s.transpose(0, 2, 1, 3).reshape(nb * bb, ht, wd)


class MeanshiftCluster2Pallas:
    """Pallas TPU port of MeanshiftCluster_2.forward (use_spatial=False path)."""

    def __init__(self, spatial_radius=2, range_radius=0.5, num_iteration=4,
                 use_bf16_exp=False, batch_block=None, vmem_budget_bytes=None):
        self.sradius = int(spatial_radius)
        self.sdiameter = 2 * self.sradius + 1
        self.rradius = float(range_radius)
        self.num_iter = int(num_iteration)
        self.rsigma = self.rradius / 3.0
        self.sqrt_pi = float(np.sqrt(2.0 * np.pi))
        # Folded constants: the Gaussian normalization 1/(sigma*sqrt(2*pi))
        # cancels in num/den; the 0.1 down-weight threshold is rescaled
        # (e*norm < rradius  <=>  e < thr  <=>  z < log(thr)) so the decision
        # is unchanged and taken on f32 z regardless of exp precision.
        self.coef = -0.5 / (self.rsigma * self.rsigma)
        self.thr = self.rradius * self.rsigma * self.sqrt_pi
        self.log_thr = float(np.log(self.thr))
        self.label_div = self.rradius + 0.01
        # bf16 EUP exp is an opt-in throughput knob for v6e/v7x; accumulation
        # and thresholding stay f32.  Off by default for tight parity with the
        # f32 reference.
        self.use_bf16_exp = bool(use_bf16_exp)
        self.batch_block = batch_block
        cap = _vmem_capacity_bytes()
        self.vmem_limit_bytes = int(min(3 * cap // 4, 100 << 20))
        self.vmem_budget_bytes = int(
            vmem_budget_bytes if vmem_budget_bytes is not None
            else self.vmem_limit_bytes // 2)
        self.multi_tc = _has_multiple_tensorcores()
        # nei_kernel / rng_kernel of the torch module are deterministic one-hot
        # shift kernels; their conv effect is reproduced exactly by the static
        # neighbour shifts inside the kernel.  spt_wght unused (use_spatial=False).

    def __call__(self, features, do_label=True):
        """features: [bs, 1, ht, wd] float32 (NCHW, C == 1)."""
        x = features[:, 0, :, :].astype(jnp.float32)       # squeeze channel
        bs, ht, wd = x.shape
        r = self.sradius
        wp, hp = wd + 2 * r, ht + 2 * r
        hp_pad = _round_up(hp, 8)
        ht_pad = _round_up(ht, 8)

        bb = self.batch_block or _auto_batch_block(
            bs, ht, wd, r, self.multi_tc, self.vmem_budget_bytes)
        assert bs % bb == 0, (bs, bb)
        nb = bs // bb
        lp = _round_up(bb * wp, 128)

        kern = functools.partial(
            _fused_meanshift_kernel, bb=bb, ht=ht, wd=wd, radius=r,
            num_iter=self.num_iter, coef=self.coef, log_thr=self.log_thr,
            label_div=self.label_div, use_bf16_exp=self.use_bf16_exp,
            emit_label=do_label, wp=wp, hp=hp, hp_pad=hp_pad, ht_pad=ht_pad,
            lp=lp)

        in_spec = pl.BlockSpec((bb, ht, wd), lambda i: (i, 0, 0))
        out_shape = [jax.ShapeDtypeStruct((nb, hp_pad, lp), jnp.float32)]
        out_specs = [pl.BlockSpec((None, hp_pad, lp), lambda i: (i, 0, 0))]
        if do_label:
            out_shape.append(jax.ShapeDtypeStruct((nb, ht_pad, lp), jnp.int32))
            out_specs.append(pl.BlockSpec((None, ht_pad, lp),
                                          lambda i: (i, 0, 0)))

        outs = pl.pallas_call(
            kern,
            out_shape=tuple(out_shape),
            grid=(nb,),
            in_specs=[in_spec],
            out_specs=tuple(out_specs),
            compiler_params=pltpu.CompilerParams(
                # TODO(synk): on v7x prefer pltpu.CORE_PARALLEL / core_map so
                # the batch-block axis provably shards across both TensorCores.
                dimension_semantics=("parallel",),
                vmem_limit_bytes=self.vmem_limit_bytes),
        )(x)

        mf = _slice_images(outs[0], nb, bb, ht, wd, r, wp, row_off=r)
        result = {"mf_fea": mf[:, None, :, :]}
        if do_label:
            lab = _slice_images(outs[1], nb, bb, ht, wd, r, wp, row_off=0)
            # TODO(synk): extract_candidates (dynamic-shape bbox / mask lists)
            # is not kernelizable; return dense meanshift output + label image.
            result["labelImgs"] = lab
        return result


def _meanshift_reference(features, radius, num_iter, coef, log_thr,
                         exp_dtype=jnp.float32):
    """Pure-JAX reference with the same folded math (f32 accumulation)."""
    x = jnp.maximum(features[:, 0, :, :].astype(jnp.float32), 0.0)
    _, ht, wd = x.shape
    d = 2 * radius + 1
    for _ in range(num_iter):
        xp = jnp.pad(x, ((0, 0), (radius, radius), (radius, radius)),
                     mode="edge")
        num = jnp.zeros_like(x)
        den = jnp.zeros_like(x)
        for kx in range(d):
            for ky in range(d):
                nbr = xp[:, ky:ky + ht, kx:kx + wd]
                diff = x - nbr
                z = coef * (diff * diff)
                scale = jnp.where(z < log_thr, 0.1, 1.0)
                e = jnp.exp(z.astype(exp_dtype)).astype(jnp.float32)
                w = e * scale
                num = num + w * nbr
                den = den + w
        x = num / den
    return x


if __name__ == "__main__":
    key = jax.random.PRNGKey(0)
    bs, ht, wd = 2, 16, 16
    features = jax.random.normal(key, (bs, 1, ht, wd), dtype=jnp.float32)

    # Small spatial_radius keeps the unrolled (2r+1)^2 neighbour loop modest.
    model = MeanshiftCluster2Pallas(spatial_radius=2, range_radius=0.5,
                                    num_iteration=4)
    out = model(features)
    mf = jax.block_until_ready(out["mf_fea"])
    labels = jax.block_until_ready(out["labelImgs"])

    assert mf.shape == (bs, 1, ht, wd) and mf.dtype == jnp.float32
    assert labels.shape == (bs, ht, wd) and labels.dtype == jnp.int32

    mf_np = np.asarray(mf[:, 0])
    assert np.all(np.isfinite(mf_np))

    # Label image must be consistent with the meanshift output it was fused with.
    lab_from_mf = np.round(mf_np / model.label_div).astype(np.int64)
    assert np.all(np.abs(np.asarray(labels).astype(np.int64) - lab_from_mf) <= 1)

    # Numeric check against a pure-JAX reference (same folded math, f32 exp).
    ref_mf = np.asarray(_meanshift_reference(
        features, model.sradius, model.num_iter, model.coef, model.log_thr))
    err = np.abs(mf_np - ref_mf)
    assert float(err.max()) < 8e-2, f"max abs err {float(err.max())}"
    assert float(err.mean()) < 2e-3, f"mean abs err {float(err.mean())}"

    # do_label=False path returns only the meanshift output, numerically equal.
    out_nl = model(features, do_label=False)
    mf_nl = np.asarray(jax.block_until_ready(out_nl["mf_fea"]))
    assert "labelImgs" not in out_nl
    np.testing.assert_allclose(mf_nl, np.asarray(mf), rtol=0.0, atol=1e-5)

    # Optional bf16-EUP exp path (v6e / v7x only): compile + finiteness smoke.
    if _bf16_exp_native():
        model_bf16 = MeanshiftCluster2Pallas(
            spatial_radius=2, range_radius=0.5, num_iteration=4,
            use_bf16_exp=True)
        mf_bf16 = np.asarray(jax.block_until_ready(
            model_bf16(features)["mf_fea"]))
        assert mf_bf16.shape == (bs, 1, ht, wd)
        assert np.all(np.isfinite(mf_bf16))

    print("KERNEL_OK")
</pallas_src>

<mosaic_0001>
module attributes {stable_mosaic.version = 11 : i64} {
  func.func @_fused_meanshift_kernel(%arg0: i32, %arg1: memref<2x16x16xf32, #tpu.memory_space<vmem>>, %arg2: memref<1x24x128xf32, #tpu.memory_space<vmem>>, %arg3: memref<1x16x128xi32, #tpu.memory_space<vmem>>) attributes {dimension_semantics = [#tpu.dimension_semantics<parallel>], iteration_bounds = array<i64: 1>, scalar_prefetch = 0 : i64, scratch_operands = 0 : i64, tpu.core_type = #tpu.core_type<tc>, window_params = [{transform_indices = @transform_0, window_bounds = array<i64: 2, 16, 16>}, {transform_indices = @transform_1, window_bounds = array<i64: 1, 24, 128>}, {transform_indices = @transform_2, window_bounds = array<i64: 1, 16, 128>}]} {
    %cst = arith.constant 0.000000e+00 : f32
    %0 = vector.broadcast %cst : f32 to vector<24x128xf32>
    %c0 = arith.constant 0 : index
    %c0_0 = arith.constant 0 : index
    %c0_1 = arith.constant 0 : index
    %1 = vector.load %arg2[%c0, %c0_0, %c0_1] : memref<1x24x128xf32, #tpu.memory_space<vmem>>, vector<1x24x128xf32>
    %2 = vector.shape_cast %1 : vector<1x24x128xf32> to vector<24x128xf32>
    %3 = vector.shape_cast %0 : vector<24x128xf32> to vector<1x24x128xf32>
    tpu.vector_store %arg2[%c0, %c0_0, %c0_1], %3 {strides = array<i32>} : memref<1x24x128xf32, #tpu.memory_space<vmem>>, vector<1x24x128xf32>,
    %c0_i32 = arith.constant 0 : i32
    %4 = vector.broadcast %c0_i32 : i32 to vector<16x128xi32>
    %c0_2 = arith.constant 0 : index
    %c0_3 = arith.constant 0 : index
    %c0_4 = arith.constant 0 : index
    %5 = vector.load %arg3[%c0_2, %c0_3, %c0_4] : memref<1x16x128xi32, #tpu.memory_space<vmem>>, vector<1x16x128xi32>
    %6 = vector.shape_cast %5 : vector<1x16x128xi32> to vector<16x128xi32>
    %7 = vector.shape_cast %4 : vector<16x128xi32> to vector<1x16x128xi32>
    tpu.vector_store %arg3[%c0_2, %c0_3, %c0_4], %7 {strides = array<i32>} : memref<1x16x128xi32, #tpu.memory_space<vmem>>, vector<1x16x128xi32>,
    %c0_5 = arith.constant 0 : index
    %c0_6 = arith.constant 0 : index
    %c0_7 = arith.constant 0 : index
    %8 = vector.load %arg1[%c0_5, %c0_6, %c0_7] : memref<2x16x16xf32, #tpu.memory_space<vmem>>, vector<2x16x16xf32>
    %cst_8 = arith.constant 0.000000e+00 : f32
    %9 = vector.broadcast %cst_8 : f32 to vector<2x16x16xf32>
    %10 = arith.maximumf %8, %9 : vector<2x16x16xf32>
    %11 = vector.extract_strided_slice %10 {offsets = [0, 0, 0], sizes = [1, 16, 16], strides = [1, 1, 1]} : vector<2x16x16xf32> to vector<1x16x16xf32>
    %12 = vector.shape_cast %11 : vector<1x16x16xf32> to vector<16x16xf32>
    %c0_9 = arith.constant 0 : index
    %c2 = arith.constant 2 : index
    %c2_10 = arith.constant 2 : index
    %13 = vector.load %arg2[%c0_9, %c2, %c2_10] : memref<1x24x128xf32, #tpu.memory_space<vmem>>, vector<1x16x16xf32>
    %14 = vector.shape_cast %13 : vector<1x16x16xf32> to vector<16x16xf32>
    %15 = vector.shape_cast %12 : vector<16x16xf32> to vector<1x16x16xf32>
    tpu.vector_store %arg2[%c0_9, %c2, %c2_10], %15 {strides = array<i32>} : memref<1x24x128xf32, #tpu.memory_space<vmem>>, vector<1x16x16xf32>,
    %16 = vector.extract_strided_slice %10 {offsets = [1, 0, 0], sizes = [1, 16, 16], strides = [1, 1, 1]} : vector<2x16x16xf32> to vector<1x16x16xf32>
    %17 = vector.shape_cast %16 : vector<1x16x16xf32> to vector<16x16xf32>
    %c0_11 = arith.constant 0 : index
    %c2_12 = arith.constant 2 : index
    %c22 = arith.constant 22 : index
    %18 = vector.load %arg2[%c0_11, %c2_12, %c22] : memref<1x24x128xf32, #tpu.memory_space<vmem>>, vector<1x16x16xf32>
    %19 = vector.shape_cast %18 : vector<1x16x16xf32> to vector<16x16xf32>
    %20 = vector.shape_cast %17 : vector<16x16xf32> to vector<1x16x16xf32>
    tpu.vector_store %arg2[%c0_11, %c2_12, %c22], %20 {strides = array<i32>} : memref<1x24x128xf32, #tpu.memory_space<vmem>>, vector<1x16x16xf32>,
    %c0_13 = arith.constant 0 : index
    %c2_14 = arith.constant 2 : index
    %c0_15 = arith.constant 0 : index
    %21 = vector.load %arg2[%c0_13, %c2_14, %c0_15] : memref<1x24x128xf32, #tpu.memory_space<vmem>>, vector<1x16x128xf32>
    %22 = vector.shape_cast %21 : vector<1x16x128xf32> to vector<16x128xf32>
    %c0_i32_16 = arith.constant 0 : i32
    %c4_i32 = arith.constant 4 : i32
    %23 = arith.addi %c0_i32_16, %c4_i32 : i32
    %c1_i32 = arith.constant 1 : i32
    %24 = scf.for %arg4 = %c0_i32_16 to %23 step %c1_i32 iter_args(%arg5 = %22) -> (vector<16x128xf32>)  : i32 {
      %c0_24 = arith.constant 0 : index
      %c2_25 = arith.constant 2 : index
      %c0_26 = arith.constant 0 : index
      %35 = vector.load %arg2[%c0_24, %c2_25, %c0_26] : memref<1x24x128xf32, #tpu.memory_space<vmem>>, vector<1x16x128xf32>
      %36 = vector.shape_cast %35 : vector<1x16x128xf32> to vector<16x128xf32>
      %37 = vector.shape_cast %arg5 : vector<16x128xf32> to vector<1x16x128xf32>
      tpu.vector_store %arg2[%c0_24, %c2_25, %c0_26], %37 {strides = array<i32>} : memref<1x24x128xf32, #tpu.memory_space<vmem>>, vector<1x16x128xf32>,
      %38 = vector.extract_strided_slice %arg5 {offsets = [0, 0], sizes = [1, 128], strides = [1, 1]} : vector<16x128xf32> to vector<1x128xf32>
      %39 = vector.shape_cast %38 : vector<1x128xf32> to vector<1x128xf32>
      %40 = vector.broadcast %39 : vector<1x128xf32> to vector<2x128xf32>
      %c0_27 = arith.constant 0 : index
      %c0_28 = arith.constant 0 : index
      %c0_29 = arith.constant 0 : index
      %41 = vector.load %arg2[%c0_27, %c0_28, %c0_29] : memref<1x24x128xf32, #tpu.memory_space<vmem>>, vector<1x2x128xf32>
      %42 = vector.shape_cast %41 : vector<1x2x128xf32> to vector<2x128xf32>
      %43 = vector.shape_cast %40 : vector<2x128xf32> to vector<1x2x128xf32>
      tpu.vector_store %arg2[%c0_27, %c0_28, %c0_29], %43 {strides = array<i32>} : memref<1x24x128xf32, #tpu.memory_space<vmem>>, vector<1x2x128xf32>,
      %44 = vector.extract_strided_slice %arg5 {offsets = [15, 0], sizes = [1, 128], strides = [1, 1]} : vector<16x128xf32> to vector<1x128xf32>
      %45 = vector.shape_cast %44 : vector<1x128xf32> to vector<1x128xf32>
      %46 = vector.broadcast %45 : vector<1x128xf32> to vector<2x128xf32>
      %c0_30 = arith.constant 0 : index
      %c18 = arith.constant 18 : index
      %c0_31 = arith.constant 0 : index
      %47 = vector.load %arg2[%c0_30, %c18, %c0_31] : memref<1x24x128xf32, #tpu.memory_space<vmem>>, vector<1x2x128xf32>
      %48 = vector.shape_cast %47 : vector<1x2x128xf32> to vector<2x128xf32>
      %49 = vector.shape_cast %46 : vector<2x128xf32> to vector<1x2x128xf32>
      tpu.vector_store %arg2[%c0_30, %c18, %c0_31], %49 {strides = array<i32>} : memref<1x24x128xf32, #tpu.memory_space<vmem>>, vector<1x2x128xf32>,
      %50 = vector.extract_strided_slice %arg5 {offsets = [0, 2], sizes = [16, 1], strides = [1, 1]} : vector<16x128xf32> to vector<16x1xf32>
      %51 = vector.extract_strided_slice %arg5 {offsets = [0, 17], sizes = [16, 1], strides = [1, 1]} : vector<16x128xf32> to vector<16x1xf32>
      %52 = vector.shape_cast %50 : vector<16x1xf32> to vector<16x1xf32>
      %53 = vector.broadcast %52 : vector<16x1xf32> to vector<16x2xf32>
      %c0_32 = arith.constant 0 : index
      %c2_33 = arith.constant 2 : index
      %c0_34 = arith.constant 0 : index
      %54 = vector.load %arg2[%c0_32, %c2_33, %c0_34] : memref<1x24x128xf32, #tpu.memory_space<vmem>>, vector<1x16x2xf32>
      %55 = vector.shape_cast %54 : vector<1x16x2xf32> to vector<16x2xf32>
      %56 = vector.shape_cast %53 : vector<16x2xf32> to vector<1x16x2xf32>
      tpu.vector_store %arg2[%c0_32, %c2_33, %c0_34], %56 {strides = array<i32>} : memref<1x24x128xf32, #tpu.memory_space<vmem>>, vector<1x16x2xf32>,
      %57 = vector.shape_cast %51 : vector<16x1xf32> to vector<16x1xf32>
      %58 = vector.broadcast %57 : vector<16x1xf32> to vector<16x2xf32>
      %c0_35 = arith.constant 0 : index
      %c2_36 = arith.constant 2 : index
      %c18_37 = arith.constant 18 : index
      %59 = vector.load %arg2[%c0_35, %c2_36, %c18_37] : memref<1x24x128xf32, #tpu.memory_space<vmem>>, vector<1x16x2xf32>
      %60 = vector.shape_cast %59 : vector<1x16x2xf32> to vector<16x2xf32>
      %61 = vector.shape_cast %58 : vector<16x2xf32> to vector<1x16x2xf32>
      tpu.vector_store %arg2[%c0_35, %c2_36, %c18_37], %61 {strides = array<i32>} : memref<1x24x128xf32, #tpu.memory_space<vmem>>, vector<1x16x2xf32>,
      %62 = vector.extract_strided_slice %arg5 {offsets = [0, 2], sizes = [1, 1], strides = [1, 1]} : vector<16x128xf32> to vector<1x1xf32>
      %63 = vector.shape_cast %62 : vector<1x1xf32> to vector<1x1xf32>
      %64 = vector.broadcast %63 : vector<1x1xf32> to vector<2x2xf32>
      %c0_38 = arith.constant 0 : index
      %c0_39 = arith.constant 0 : index
      %c0_40 = arith.constant 0 : index
      %65 = vector.load %arg2[%c0_38, %c0_39, %c0_40] : memref<1x24x128xf32, #tpu.memory_space<vmem>>, vector<1x2x2xf32>
      %66 = vector.shape_cast %65 : vector<1x2x2xf32> to vector<2x2xf32>
      %67 = vector.shape_cast %64 : vector<2x2xf32> to vector<1x2x2xf32>
      tpu.vector_store %arg2[%c0_38, %c0_39, %c0_40], %67 {strides = array<i32>} : memref<1x24x128xf32, #tpu.memory_space<vmem>>, vector<1x2x2xf32>,
      %68 = vector.extract_strided_slice %arg5 {offsets = [0, 17], sizes = [1, 1], strides = [1, 1]} : vector<16x128xf32> to vector<1x1xf32>
      %69 = vector.shape_cast %68 : vector<1x1xf32> to vector<1x1xf32>
      %70 = vector.broadcast %69 : vector<1x1xf32> to vector<2x2xf32>
      %c0_41 = arith.constant 0 : index
      %c0_42 = arith.constant 0 : index
      %c18_43 = arith.constant 18 : index
      %71 = vector.load %arg2[%c0_41, %c0_42, %c18_43] : memref<1x24x128xf32, #tpu.memory_space<vmem>>, vector<1x2x2xf32>
      %72 = vector.shape_cast %71 : vector<1x2x2xf32> to vector<2x2xf32>
      %73 = vector.shape_cast %70 : vector<2x2xf32> to vector<1x2x2xf32>
      tpu.vector_store %arg2[%c0_41, %c0_42, %c18_43], %73 {strides = array<i32>} : memref<1x24x128xf32, #tpu.memory_space<vmem>>, vector<1x2x2xf32>,
      %74 = vector.extract_strided_slice %arg5 {offsets = [15, 2], sizes = [1, 1], strides = [1, 1]} : vector<16x128xf32> to vector<1x1xf32>
      %75 = vector.shape_cast %74 : vector<1x1xf32> to vector<1x1xf32>
      %76 = vector.broadcast %75 : vector<1x1xf32> to vector<2x2xf32>
      %c0_44 = arith.constant 0 : index
      %c18_45 = arith.constant 18 : index
      %c0_46 = arith.constant 0 : index
      %77 = vector.load %arg2[%c0_44, %c18_45, %c0_46] : memref<1x24x128xf32, #tpu.memory_space<vmem>>, vector<1x2x2xf32>
      %78 = vector.shape_cast %77 : vector<1x2x2xf32> to vector<2x2xf32>
      %79 = vector.shape_cast %76 : vector<2x2xf32> to vector<1x2x2xf32>
      tpu.vector_store %arg2[%c0_44, %c18_45, %c0_46], %79 {strides = array<i32>} : memref<1x24x128xf32, #tpu.memory_space<vmem>>, vector<1x2x2xf32>,
      %80 = vector.extract_strided_slice %arg5 {offsets = [15, 17], sizes = [1, 1], strides = [1, 1]} : vector<16x128xf32> to vector<1x1xf32>
      %81 = vector.shape_cast %80 : vector<1x1xf32> to vector<1x1xf32>
      %82 = vector.broadcast %81 : vector<1x1xf32> to vector<2x2xf32>
      %c0_47 = arith.constant 0 : index
      %c18_48 = arith.constant 18 : index
      %c18_49 = arith.constant 18 : index
      %83 = vector.load %arg2[%c0_47, %c18_48, %c18_49] : memref<1x24x128xf32, #tpu.memory_space<vmem>>, vector<1x2x2xf32>
      %84 = vector.shape_cast %83 : vector<1x2x2xf32> to vector<2x2xf32>
      %85 = vector.shape_cast %82 : vector<2x2xf32> to vector<1x2x2xf32>
      tpu.vector_store %arg2[%c0_47, %c18_48, %c18_49], %85 {strides = array<i32>} : memref<1x24x128xf32, #tpu.memory_space<vmem>>, vector<1x2x2xf32>,
      %86 = vector.extract_strided_slice %arg5 {offsets = [0, 22], sizes = [16, 1], strides = [1, 1]} : vector<16x128xf32> to vector<16x1xf32>
      %87 = vector.extract_strided_slice %arg5 {offsets = [0, 37], sizes = [16, 1], strides = [1, 1]} : vector<16x128xf32> to vector<16x1xf32>
      %88 = vector.shape_cast %86 : vector<16x1xf32> to vector<16x1xf32>
      %89 = vector.broadcast %88 : vector<16x1xf32> to vector<16x2xf32>
      %c0_50 = arith.constant 0 : index
      %c2_51 = arith.constant 2 : index
      %c20 = arith.constant 20 : index
      %90 = vector.load %arg2[%c0_50, %c2_51, %c20] : memref<1x24x128xf32, #tpu.memory_space<vmem>>, vector<1x16x2xf32>
      %91 = vector.shape_cast %90 : vector<1x16x2xf32> to vector<16x2xf32>
      %92 = vector.shape_cast %89 : vector<16x2xf32> to vector<1x16x2xf32>
      tpu.vector_store %arg2[%c0_50, %c2_51, %c20], %92 {strides = array<i32>} : memref<1x24x128xf32, #tpu.memory_space<vmem>>, vector<1x16x2xf32>,
      %93 = vector.shape_cast %87 : vector<16x1xf32> to vector<16x1xf32>
      %94 = vector.broadcast %93 : vector<16x1xf32> to vector<16x2xf32>
      %c0_52 = arith.constant 0 : index
      %c2_53 = arith.constant 2 : index
      %c38 = arith.constant 38 : index
      %95 = vector.load %arg2[%c0_52, %c2_53, %c38] : memref<1x24x128xf32, #tpu.memory_space<vmem>>, vector<1x16x2xf32>
      %96 = vector.shape_cast %95 : vector<1x16x2xf32> to vector<16x2xf32>
      %97 = vector.shape_cast %94 : vector<16x2xf32> to vector<1x16x2xf32>
      tpu.vector_store %arg2[%c0_52, %c2_53, %c38], %97 {strides = array<i32>} : memref<1x24x128xf32, #tpu.memory_space<vmem>>, vector<1x16x2xf32>,
      %98 = vector.extract_strided_slice %arg5 {offsets = [0, 22], sizes = [1, 1], strides = [1, 1]} : vector<16x128xf32> to vector<1x1xf32>
      %99 = vector.shape_cast %98 : vector<1x1xf32> to vector<1x1xf32>
      %100 = vector.broadcast %99 : vector<1x1xf32> to vector<2x2xf32>
      %c0_54 = arith.constant 0 : index
      %c0_55 = arith.constant 0 : index
      %c20_56 = arith.constant 20 : index
      %101 = vector.load %arg2[%c0_54, %c0_55, %c20_56] : memref<1x24x128xf32, #tpu.memory_space<vmem>>, vector<1x2x2xf32>
      %102 = vector.shape_cast %101 : vector<1x2x2xf32> to vector<2x2xf32>
      %103 = vector.shape_cast %100 : vector<2x2xf32> to vector<1x2x2xf32>
      tpu.vector_store %arg2[%c0_54, %c0_55, %c20_56], %103 {strides = array<i32>} : memref<1x24x128xf32, #tpu.memory_space<vmem>>, vector<1x2x2xf32>,
      %104 = vector.extract_strided_slice %arg5 {offsets = [0, 37], sizes = [1, 1], strides = [1, 1]} : vector<16x128xf32> to vector<1x1xf32>
      %105 = vector.shape_cast %104 : vector<1x1xf32> to vector<1x1xf32>
      %106 = vector.broadcast %105 : vector<1x1xf32> to vector<2x2xf32>
      %c0_57 = arith.constant 0 : index
      %c0_58 = arith.constant 0 : index
      %c38_59 = arith.constant 38 : index
      %107 = vector.load %arg2[%c0_57, %c0_58, %c38_59] : memref<1x24x128xf32, #tpu.memory_space<vmem>>, vector<1x2x2xf32>
      %108 = vector.shape_cast %107 : vector<1x2x2xf32> to vector<2x2xf32>
      %109 = vector.shape_cast %106 : vector<2x2xf32> to vector<1x2x2xf32>
      tpu.vector_store %arg2[%c0_57, %c0_58, %c38_59], %109 {strides = array<i32>} : memref<1x24x128xf32, #tpu.memory_space<vmem>>, vector<1x2x2xf32>,
      %110 = vector.extract_strided_slice %arg5 {offsets = [15, 22], sizes = [1, 1], strides = [1, 1]} : vector<16x128xf32> to vector<1x1xf32>
      %111 = vector.shape_cast %110 : vector<1x1xf32> to vector<1x1xf32>
      %112 = vector.broadcast %111 : vector<1x1xf32> to vector<2x2xf32>
      %c0_60 = arith.constant 0 : index
      %c18_61 = arith.constant 18 : index
      %c20_62 = arith.constant 20 : index
      %113 = vector.load %arg2[%c0_60, %c18_61, %c20_62] : memref<1x24x128xf32, #tpu.memory_space<vmem>>, vector<1x2x2xf32>
      %114 = vector.shape_cast %113 : vector<1x2x2xf32> to vector<2x2xf32>
      %115 = vector.shape_cast %112 : vector<2x2xf32> to vector<1x2x2xf32>
      tpu.vector_store %arg2[%c0_60, %c18_61, %c20_62], %115 {strides = array<i32>} : memref<1x24x128xf32, #tpu.memory_space<vmem>>, vector<1x2x2xf32>,
      %116 = vector.extract_strided_slice %arg5 {offsets = [15, 37], sizes = [1, 1], strides = [1, 1]} : vector<16x128xf32> to vector<1x1xf32>
      %117 = vector.shape_cast %116 : vector<1x1xf32> to vector<1x1xf32>
      %118 = vector.broadcast %117 : vector<1x1xf32> to vector<2x2xf32>
      %c0_63 = arith.constant 0 : index
      %c18_64 = arith.constant 18 : index
      %c38_65 = arith.constant 38 : index
      %119 = vector.load %arg2[%c0_63, %c18_64, %c38_65] : memref<1x24x128xf32, #tpu.memory_space<vmem>>, vector<1x2x2xf32>
      %120 = vector.shape_cast %119 : vector<1x2x2xf32> to vector<2x2xf32>
      %121 = vector.shape_cast %118 : vector<2x2xf32> to vector<1x2x2xf32>
      tpu.vector_store %arg2[%c0_63, %c18_64, %c38_65], %121 {strides = array<i32>} : memref<1x24x128xf32, #tpu.memory_space<vmem>>, vector<1x2x2xf32>,
      %c0_66 = arith.constant 0 : index
      %c0_67 = arith.constant 0 : index
      %c0_68 = arith.constant 0 : index
      %122 = vector.load %arg2[%c0_66, %c0_67, %c0_68] : memref<1x24x128xf32, #tpu.memory_space<vmem>>, vector<1x24x128xf32>
      %123 = vector.shape_cast %122 : vector<1x24x128xf32> to vector<24x128xf32>
      %cst_69 = arith.constant 0.000000e+00 : f32
      %124 = vector.broadcast %cst_69 : f32 to vector<16x128xf32>
      %cst_70 = arith.constant 0.000000e+00 : f32
      %125 = vector.broadcast %cst_70 : f32 to vector<16x128xf32>
      %c126_i32 = arith.constant 126 : i32
      %126 = tpu.dynamic_rotate %123 by %c126_i32 dim 1 : vector<24x128xf32>, i32 -> vector<24x128xf32>
      %127 = vector.extract_strided_slice %126 {offsets = [0, 0], sizes = [16, 128], strides = [1, 1]} : vector<24x128xf32> to vector<16x128xf32>
      %128 = arith.subf %arg5, %127 : vector<16x128xf32>
      %129 = arith.mulf %128, %128 : vector<16x128xf32>
      %cst_71 = arith.constant -1.800000e+01 : f32
      %130 = vector.broadcast %cst_71 : f32 to vector<16x128xf32>
      %131 = arith.mulf %130, %129 : vector<16x128xf32>
      %cst_72 = arith.constant -1.56596816 : f32
      %132 = vector.broadcast %cst_72 : f32 to vector<16x128xf32>
      %133 = arith.cmpf olt, %131, %132 : vector<16x128xf32>
      %cst_73 = arith.constant 1.000000e-01 : f32
      %cst_74 = arith.constant 1.000000e+00 : f32
      %134 = vector.broadcast %cst_73 : f32 to vector<16x128xf32>
      %135 = vector.broadcast %cst_74 : f32 to vector<16x128xf32>
      %136 = arith.select %133, %134, %135 : vector<16x128xi1>, vector<16x128xf32>
      %137 = math.exp %131 : vector<16x128xf32>
      %138 = arith.mulf %137, %136 : vector<16x128xf32>
      %139 = arith.mulf %138, %127 : vector<16x128xf32>
      %140 = arith.addf %124, %139 : vector<16x128xf32>
      %141 = arith.addf %125, %138 : vector<16x128xf32>
      %142 = vector.extract_strided_slice %126 {offsets = [1, 0], sizes = [16, 128], strides = [1, 1]} : vector<24x128xf32> to vector<16x128xf32>
      %143 = arith.subf %arg5, %142 : vector<16x128xf32>
      %144 = arith.mulf %143, %143 : vector<16x128xf32>
      %cst_75 = arith.constant -1.800000e+01 : f32
      %145 = vector.broadcast %cst_75 : f32 to vector<16x128xf32>
      %146 = arith.mulf %145, %144 : vector<16x128xf32>
      %cst_76 = arith.constant -1.56596816 : f32
      %147 = vector.broadcast %cst_76 : f32 to vector<16x128xf32>
      %148 = arith.cmpf olt, %146, %147 : vector<16x128xf32>
      %cst_77 = arith.constant 1.000000e-01 : f32
      %cst_78 = arith.constant 1.000000e+00 : f32
      %149 = vector.broadcast %cst_77 : f32 to vector<16x128xf32>
      %150 = vector.broadcast %cst_78 : f32 to vector<16x128xf32>
      %151 = arith.select %148, %149, %150 : vector<16x128xi1>, vector<16x128xf32>
      %152 = math.exp %146 : vector<16x128xf32>
      %153 = arith.mulf %152, %151 : vector<16x128xf32>
      %154 = arith.mulf %153, %142 : vector<16x128xf32>
      %155 = arith.addf %140, %154 : vector<16x128xf32>
      %156 = arith.addf %141, %153 : vector<16x128xf32>
      %157 = vector.extract_strided_slice %126 {offsets = [2, 0], sizes = [16, 128], strides = [1, 1]} : vector<24x128xf32> to vector<16x128xf32>
      %158 = arith.subf %arg5, %157 : vector<16x128xf32>
      %159 = arith.mulf %158, %158 : vector<16x128xf32>
      %cst_79 = arith.constant -1.800000e+01 : f32
      %160 = vector.broadcast %cst_79 : f32 to vector<16x128xf32>
      %161 = arith.mulf %160, %159 : vector<16x128xf32>
      %cst_80 = arith.constant -1.56596816 : f32
      %162 = vector.broadcast %cst_80 : f32 to vector<16x128xf32>
      %163 = arith.cmpf olt, %161, %162 : vector<16x128xf32>
      %cst_81 = arith.constant 1.000000e-01 : f32
      %cst_82 = arith.constant 1.000000e+00 : f32
      %164 = vector.broadcast %cst_81 : f32 to vector<16x128xf32>
      %165 = vector.broadcast %cst_82 : f32 to vector<16x128xf32>
      %166 = arith.select %163, %164, %165 : vector<16x128xi1>, vector<16x128xf32>
      %167 = math.exp %161 : vector<16x128xf32>
      %168 = arith.mulf %167, %166 : vector<16x128xf32>
      %169 = arith.mulf %168, %157 : vector<16x128xf32>
      %170 = arith.addf %155, %169 : vector<16x128xf32>
      %171 = arith.addf %156, %168 : vector<16x128xf32>
      %172 = vector.extract_strided_slice %126 {offsets = [3, 0], sizes = [16, 128], strides = [1, 1]} : vector<24x128xf32> to vector<16x128xf32>
      %173 = arith.subf %arg5, %172 : vector<16x128xf32>
      %174 = arith.mulf %173, %173 : vector<16x128xf32>
      %cst_83 = arith.constant -1.800000e+01 : f32
      %175 = vector.broadcast %cst_83 : f32 to vector<16x128xf32>
      %176 = arith.mulf %175, %174 : vector<16x128xf32>
      %cst_84 = arith.constant -1.56596816 : f32
      %177 = vector.broadcast %cst_84 : f32 to vector<16x128xf32>
      %178 = arith.cmpf olt, %176, %177 : vector<16x128xf32>
      %cst_85 = arith.constant 1.000000e-01 : f32
      %cst_86 = arith.constant 1.000000e+00 : f32
      %179 = vector.broadcast %cst_85 : f32 to vector<16x128xf32>
      %180 = vector.broadcast %cst_86 : f32 to vector<16x128xf32>
      %181 = arith.select %178, %179, %180 : vector<16x128xi1>, vector<16x128xf32>
      %182 = math.exp %176 : vector<16x128xf32>
      %183 = arith.mulf %182, %181 : vector<16x128xf32>
      %184 = arith.mulf %183, %172 : vector<16x128xf32>
      %185 = arith.addf %170, %184 : vector<16x128xf32>
      %186 = arith.addf %171, %183 : vector<16x128xf32>
      %187 = vector.extract_strided_slice %126 {offsets = [4, 0], sizes = [16, 128], strides = [1, 1]} : vector<24x128xf32> to vector<16x128xf32>
      %188 = arith.subf %arg5, %187 : vector<16x128xf32>
      %189 = arith.mulf %188, %188 : vector<16x128xf32>
      %cst_87 = arith.constant -1.800000e+01 : f32
      %190 = vector.broadcast %cst_87 : f32 to vector<16x128xf32>
      %191 = arith.mulf %190, %189 : vector<16x128xf32>
      %cst_88 = arith.constant -1.56596816 : f32
      %192 = vector.broadcast %cst_88 : f32 to vector<16x128xf32>
      %193 = arith.cmpf olt, %191, %192 : vector<16x128xf32>
      %cst_89 = arith.constant 1.000000e-01 : f32
      %cst_90 = arith.constant 1.000000e+00 : f32
      %194 = vector.broadcast %cst_89 : f32 to vector<16x128xf32>
      %195 = vector.broadcast %cst_90 : f32 to vector<16x128xf32>
      %196 = arith.select %193, %194, %195 : vector<16x128xi1>, vector<16x128xf32>
      %197 = math.exp %191 : vector<16x128xf32>
      %198 = arith.mulf %197, %196 : vector<16x128xf32>
      %199 = arith.mulf %198, %187 : vector<16x128xf32>
      %200 = arith.addf %185, %199 : vector<16x128xf32>
      %201 = arith.addf %186, %198 : vector<16x128xf32>
      %c127_i32 = arith.constant 127 : i32
      %202 = tpu.dynamic_rotate %123 by %c127_i32 dim 1 : vector<24x128xf32>, i32 -> vector<24x128xf32>
      %203 = vector.extract_strided_slice %202 {offsets = [0, 0], sizes = [16, 128], strides = [1, 1]} : vector<24x128xf32> to vector<16x128xf32>
      %204 = arith.subf %arg5, %203 : vector<16x128xf32>
      %205 = arith.mulf %204, %204 : vector<16x128xf32>
      %cst_91 = arith.constant -1.800000e+01 : f32
      %206 = vector.broadcast %cst_91 : f32 to vector<16x128xf32>
      %207 = arith.mulf %206, %205 : vector<16x128xf32>
      %cst_92 = arith.constant -1.56596816 : f32
      %208 = vector.broadcast %cst_92 : f32 to vector<16x128xf32>
      %209 = arith.cmpf olt, %207, %208 : vector<16x128xf32>
      %cst_93 = arith.constant 1.000000e-01 : f32
      %cst_94 = arith.constant 1.000000e+00 : f32
      %210 = vector.broadcast %cst_93 : f32 to vector<16x128xf32>
      %211 = vector.broadcast %cst_94 : f32 to vector<16x128xf32>
      %212 = arith.select %209, %210, %211 : vector<16x128xi1>, vector<16x128xf32>
      %213 = math.exp %207 : vector<16x128xf32>
      %214 = arith.mulf %213, %212 : vector<16x128xf32>
      %215 = arith.mulf %214, %203 : vector<16x128xf32>
      %216 = arith.addf %200, %215 : vector<16x128xf32>
      %217 = arith.addf %201, %214 : vector<16x128xf32>
      %218 = vector.extract_strided_slice %202 {offsets = [1, 0], sizes = [16, 128], strides = [1, 1]} : vector<24x128xf32> to vector<16x128xf32>
      %219 = arith.subf %arg5, %218 : vector<16x128xf32>
      %220 = arith.mulf %219, %219 : vector<16x128xf32>
      %cst_95 = arith.constant -1.800000e+01 : f32
      %221 = vector.broadcast %cst_95 : f32 to vector<16x128xf32>
      %222 = arith.mulf %221, %220 : vector<16x128xf32>
      %cst_96 = arith.constant -1.56596816 : f32
      %223 = vector.broadcast %cst_96 : f32 to vector<16x128xf32>
      %224 = arith.cmpf olt, %222, %223 : vector<16x128xf32>
      %cst_97 = arith.constant 1.000000e-01 : f32
      %cst_98 = arith.constant 1.000000e+00 : f32
      %225 = vector.broadcast %cst_97 : f32 to vector<16x128xf32>
      %226 = vector.broadcast %cst_98 : f32 to vector<16x128xf32>
      %227 = arith.select %224, %225, %226 : vector<16x128xi1>, vector<16x128xf32>
      %228 = math.exp %222 : vector<16x128xf32>
      %229 = arith.mulf %228, %227 : vector<16x128xf32>
      %230 = arith.mulf %229, %218 : vector<16x128xf32>
      %231 = arith.addf %216, %230 : vector<16x128xf32>
      %232 = arith.addf %217, %229 : vector<16x128xf32>
      %233 = vector.extract_strided_slice %202 {offsets = [2, 0], sizes = [16, 128], strides = [1, 1]} : vector<24x128xf32> to vector<16x128xf32>
      %234 = arith.subf %arg5, %233 : vector<16x128xf32>
      %235 = arith.mulf %234, %234 : vector<16x128xf32>
      %cst_99 = arith.constant -1.800000e+01 : f32
      %236 = vector.broadcast %cst_99 : f32 to vector<16x128xf32>
      %237 = arith.mulf %236, %235 : vector<16x128xf32>
      %cst_100 = arith.constant -1.56596816 : f32
      %238 = vector.broadcast %cst_100 : f32 to vector<16x128xf32>
      %239 = arith.cmpf olt, %237, %238 : vector<16x128xf32>
      %cst_101 = arith.constant 1.000000e-01 : f32
      %cst_102 = arith.constant 1.000000e+00 : f32
      %240 = vector.broadcast %cst_101 : f32 to vector<16x128xf32>
      %241 = vector.broadcast %cst_102 : f32 to vector<16x128xf32>
      %242 = arith.select %239, %240, %241 : vector<16x128xi1>, vector<16x128xf32>
      %243 = math.exp %237 : vector<16x128xf32>
      %244 = arith.mulf %243, %242 : vector<16x128xf32>
      %245 = arith.mulf %244, %233 : vector<16x128xf32>
      %246 = arith.addf %231, %245 : vector<16x128xf32>
      %247 = arith.addf %232, %244 : vector<16x128xf32>
      %248 = vector.extract_strided_slice %202 {offsets = [3, 0], sizes = [16, 128], strides = [1, 1]} : vector<24x128xf32> to vector<16x128xf32>
      %249 = arith.subf %arg5, %248 : vector<16x128xf32>
      %250 = arith.mulf %249, %249 : vector<16x128xf32>
      %cst_103 = arith.constant -1.800000e+01 : f32
      %251 = vector.broadcast %cst_103 : f32 to vector<16x128xf32>
      %252 = arith.mulf %251, %250 : vector<16x128xf32>
      %cst_104 = arith.constant -1.56596816 : f32
      %253 = vector.broadcast %cst_104 : f32 to vector<16x128xf32>
      %254 = arith.cmpf olt, %252, %253 : vector<16x128xf32>
      %cst_105 = arith.constant 1.000000e-01 : f32
      %cst_106 = arith.constant 1.000000e+00 : f32
      %255 = vector.broadcast %cst_105 : f32 to vector<16x128xf32>
      %256 = vector.broadcast %cst_106 : f32 to vector<16x128xf32>
      %257 = arith.select %254, %255, %256 : vector<16x128xi1>, vector<16x128xf32>
      %258 = math.exp %252 : vector<16x128xf32>
      %259 = arith.mulf %258, %257 : vector<16x128xf32>
      %260 = arith.mulf %259, %248 : vector<16x128xf32>
      %261 = arith.addf %246, %260 : vector<16x128xf32>
      %262 = arith.addf %247, %259 : vector<16x128xf32>
      %263 = vector.extract_strided_slice %202 {offsets = [4, 0], sizes = [16, 128], strides = [1, 1]} : vector<24x128xf32> to vector<16x128xf32>
      %264 = arith.subf %arg5, %263 : vector<16x128xf32>
      %265 = arith.mulf %264, %264 : vector<16x128xf32>
      %cst_107 = arith.constant -1.800000e+01 : f32
      %266 = vector.broadcast %cst_107 : f32 to vector<16x128xf32>
      %267 = arith.mulf %266, %265 : vector<16x128xf32>
      %cst_108 = arith.constant -1.56596816 : f32
      %268 = vector.broadcast %cst_108 : f32 to vector<16x128xf32>
      %269 = arith.cmpf olt, %267, %268 : vector<16x128xf32>
      %cst_109 = arith.constant 1.000000e-01 : f32
      %cst_110 = arith.constant 1.000000e+00 : f32
      %270 = vector.broadcast %cst_109 : f32 to vector<16x128xf32>
      %271 = vector.broadcast %cst_110 : f32 to vector<16x128xf32>
      %272 = arith.select %269, %270, %271 : vector<16x128xi1>, vector<16x128xf32>
      %273 = math.exp %267 : vector<16x128xf32>
      %274 = arith.mulf %273, %272 : vector<16x128xf32>
      %275 = arith.mulf %274, %263 : vector<16x128xf32>
      %276 = arith.addf %261, %275 : vector<16x128xf32>
      %277 = arith.addf %262, %274 : vector<16x128xf32>
      %278 = vector.extract_strided_slice %123 {offsets = [0, 0], sizes = [16, 128], strides = [1, 1]} : vector<24x128xf32> to vector<16x128xf32>
      %279 = arith.subf %arg5, %278 : vector<16x128xf32>
      %280 = arith.mulf %279, %279 : vector<16x128xf32>
      %cst_111 = arith.constant -1.800000e+01 : f32
      %281 = vector.broadcast %cst_111 : f32 to vector<16x128xf32>
      %282 = arith.mulf %281, %280 : vector<16x128xf32>
      %cst_112 = arith.constant -1.56596816 : f32
      %283 = vector.broadcast %cst_112 : f32 to vector<16x128xf32>
      %284 = arith.cmpf olt, %282, %283 : vector<16x128xf32>
      %cst_113 = arith.constant 1.000000e-01 : f32
      %cst_114 = arith.constant 1.000000e+00 : f32
      %285 = vector.broadcast %cst_113 : f32 to vector<16x128xf32>
      %286 = vector.broadcast %cst_114 : f32 to vector<16x128xf32>
      %287 = arith.select %284, %285, %286 : vector<16x128xi1>, vector<16x128xf32>
      %288 = math.exp %282 : vector<16x128xf32>
      %289 = arith.mulf %288, %287 : vector<16x128xf32>
      %290 = arith.mulf %289, %278 : vector<16x128xf32>
      %291 = arith.addf %276, %290 : vector<16x128xf32>
      %292 = arith.addf %277, %289 : vector<16x128xf32>
      %293 = vector.extract_strided_slice %123 {offsets = [1, 0], sizes = [16, 128], strides = [1, 1]} : vector<24x128xf32> to vector<16x128xf32>
      %294 = arith.subf %arg5, %293 : vector<16x128xf32>
      %295 = arith.mulf %294, %294 : vector<16x128xf32>
      %cst_115 = arith.constant -1.800000e+01 : f32
      %296 = vector.broadcast %cst_115 : f32 to vector<16x128xf32>
      %297 = arith.mulf %296, %295 : vector<16x128xf32>
      %cst_116 = arith.constant -1.56596816 : f32
      %298 = vector.broadcast %cst_116 : f32 to vector<16x128xf32>
      %299 = arith.cmpf olt, %297, %298 : vector<16x128xf32>
      %cst_117 = arith.constant 1.000000e-01 : f32
      %cst_118 = arith.constant 1.000000e+00 : f32
      %300 = vector.broadcast %cst_117 : f32 to vector<16x128xf32>
      %301 = vector.broadcast %cst_118 : f32 to vector<16x128xf32>
      %302 = arith.select %299, %300, %301 : vector<16x128xi1>, vector<16x128xf32>
      %303 = math.exp %297 : vector<16x128xf32>
      %304 = arith.mulf %303, %302 : vector<16x128xf32>
      %305 = arith.mulf %304, %293 : vector<16x128xf32>
      %306 = arith.addf %291, %305 : vector<16x128xf32>
      %307 = arith.addf %292, %304 : vector<16x128xf32>
      %308 = vector.extract_strided_slice %123 {offsets = [2, 0], sizes = [16, 128], strides = [1, 1]} : vector<24x128xf32> to vector<16x128xf32>
      %309 = arith.subf %arg5, %308 : vector<16x128xf32>
      %310 = arith.mulf %309, %309 : vector<16x128xf32>
      %cst_119 = arith.constant -1.800000e+01 : f32
      %311 = vector.broadcast %cst_119 : f32 to vector<16x128xf32>
      %312 = arith.mulf %311, %310 : vector<16x128xf32>
      %cst_120 = arith.constant -1.56596816 : f32
      %313 = vector.broadcast %cst_120 : f32 to vector<16x128xf32>
      %314 = arith.cmpf olt, %312, %313 : vector<16x128xf32>
      %cst_121 = arith.constant 1.000000e-01 : f32
      %cst_122 = arith.constant 1.000000e+00 : f32
      %315 = vector.broadcast %cst_121 : f32 to vector<16x128xf32>
      %316 = vector.broadcast %cst_122 : f32 to vector<16x128xf32>
      %317 = arith.select %314, %315, %316 : vector<16x128xi1>, vector<16x128xf32>
      %318 = math.exp %312 : vector<16x128xf32>
      %319 = arith.mulf %318, %317 : vector<16x128xf32>
      %320 = arith.mulf %319, %308 : vector<16x128xf32>
      %321 = arith.addf %306, %320 : vector<16x128xf32>
      %322 = arith.addf %307, %319 : vector<16x128xf32>
      %323 = vector.extract_strided_slice %123 {offsets = [3, 0], sizes = [16, 128], strides = [1, 1]} : vector<24x128xf32> to vector<16x128xf32>
      %324 = arith.subf %arg5, %323 : vector<16x128xf32>
      %325 = arith.mulf %324, %324 : vector<16x128xf32>
      %cst_123 = arith.constant -1.800000e+01 : f32
      %326 = vector.broadcast %cst_123 : f32 to vector<16x128xf32>
      %327 = arith.mulf %326, %325 : vector<16x128xf32>
      %cst_124 = arith.constant -1.56596816 : f32
      %328 = vector.broadcast %cst_124 : f32 to vector<16x128xf32>
      %329 = arith.cmpf olt, %327, %328 : vector<16x128xf32>
      %cst_125 = arith.constant 1.000000e-01 : f32
      %cst_126 = arith.constant 1.000000e+00 : f32
      %330 = vector.broadcast %cst_125 : f32 to vector<16x128xf32>
      %331 = vector.broadcast %cst_126 : f32 to vector<16x128xf32>
      %332 = arith.select %329, %330, %331 : vector<16x128xi1>, vector<16x128xf32>
      %333 = math.exp %327 : vector<16x128xf32>
      %334 = arith.mulf %333, %332 : vector<16x128xf32>
      %335 = arith.mulf %334, %323 : vector<16x128xf32>
      %336 = arith.addf %321, %335 : vector<16x128xf32>
      %337 = arith.addf %322, %334 : vector<16x128xf32>
      %338 = vector.extract_strided_slice %123 {offsets = [4, 0], sizes = [16, 128], strides = [1, 1]} : vector<24x128xf32> to vector<16x128xf32>
      %339 = arith.subf %arg5, %338 : vector<16x128xf32>
      %340 = arith.mulf %339, %339 : vector<16x128xf32>
      %cst_127 = arith.constant -1.800000e+01 : f32
      %341 = vector.broadcast %cst_127 : f32 to vector<16x128xf32>
      %342 = arith.mulf %341, %340 : vector<16x128xf32>
      %cst_128 = arith.constant -1.56596816 : f32
      %343 = vector.broadcast %cst_128 : f32 to vector<16x128xf32>
      %344 = arith.cmpf olt, %342, %343 : vector<16x128xf32>
      %cst_129 = arith.constant 1.000000e-01 : f32
      %cst_130 = arith.constant 1.000000e+00 : f32
      %345 = vector.broadcast %cst_129 : f32 to vector<16x128xf32>
      %346 = vector.broadcast %cst_130 : f32 to vector<16x128xf32>
      %347 = arith.select %344, %345, %346 : vector<16x128xi1>, vector<16x128xf32>
      %348 = math.exp %342 : vector<16x128xf32>
      %349 = arith.mulf %348, %347 : vector<16x128xf32>
      %350 = arith.mulf %349, %338 : vector<16x128xf32>
      %351 = arith.addf %336, %350 : vector<16x128xf32>
      %352 = arith.addf %337, %349 : vector<16x128xf32>
      %c1_i32_131 = arith.constant 1 : i32
      %353 = tpu.dynamic_rotate %123 by %c1_i32_131 dim 1 : vector<24x128xf32>, i32 -> vector<24x128xf32>
      %354 = vector.extract_strided_slice %353 {offsets = [0, 0], sizes = [16, 128], strides = [1, 1]} : vector<24x128xf32> to vector<16x128xf32>
      %355 = arith.subf %arg5, %354 : vector<16x128xf32>
      %356 = arith.mulf %355, %355 : vector<16x128xf32>
      %cst_132 = arith.constant -1.800000e+01 : f32
      %357 = vector.broadcast %cst_132 : f32 to vector<16x128xf32>
      %358 = arith.mulf %357, %356 : vector<16x128xf32>
      %cst_133 = arith.constant -1.56596816 : f32
      %359 = vector.broadcast %cst_133 : f32 to vector<16x128xf32>
      %360 = arith.cmpf olt, %358, %359 : vector<16x128xf32>
      %cst_134 = arith.constant 1.000000e-01 : f32
      %cst_135 = arith.constant 1.000000e+00 : f32
      %361 = vector.broadcast %cst_134 : f32 to vector<16x128xf32>
      %362 = vector.broadcast %cst_135 : f32 to vector<16x128xf32>
      %363 = arith.select %360, %361, %362 : vector<16x128xi1>, vector<16x128xf32>
      %364 = math.exp %358 : vector<16x128xf32>
      %365 = arith.mulf %364, %363 : vector<16x128xf32>
      %366 = arith.mulf %365, %354 : vector<16x128xf32>
      %367 = arith.addf %351, %366 : vector<16x128xf32>
      %368 = arith.addf %352, %365 : vector<16x128xf32>
      %369 = vector.extract_strided_slice %353 {offsets = [1, 0], sizes = [16, 128], strides = [1, 1]} : vector<24x128xf32> to vector<16x128xf32>
      %370 = arith.subf %arg5, %369 : vector<16x128xf32>
      %371 = arith.mulf %370, %370 : vector<16x128xf32>
      %cst_136 = arith.constant -1.800000e+01 : f32
      %372 = vector.broadcast %cst_136 : f32 to vector<16x128xf32>
      %373 = arith.mulf %372, %371 : vector<16x128xf32>
      %cst_137 = arith.constant -1.56596816 : f32
      %374 = vector.broadcast %cst_137 : f32 to vector<16x128xf32>
      %375 = arith.cmpf olt, %373, %374 : vector<16x128xf32>
      %cst_138 = arith.constant 1.000000e-01 : f32
      %cst_139 = arith.constant 1.000000e+00 : f32
      %376 = vector.broadcast %cst_138 : f32 to vector<16x128xf32>
      %377 = vector.broadcast %cst_139 : f32 to vector<16x128xf32>
      %378 = arith.select %375, %376, %377 : vector<16x128xi1>, vector<16x128xf32>
      %379 = math.exp %373 : vector<16x128xf32>
      %380 = arith.mulf %379, %378 : vector<16x128xf32>
      %381 = arith.mulf %380, %369 : vector<16x128xf32>
      %382 = arith.addf %367, %381 : vector<16x128xf32>
      %383 = arith.addf %368, %380 : vector<16x128xf32>
      %384 = vector.extract_strided_slice %353 {offsets = [2, 0], sizes = [16, 128], strides = [1, 1]} : vector<24x128xf32> to vector<16x128xf32>
      %385 = arith.subf %arg5, %384 : vector<16x128xf32>
      %386 = arith.mulf %385, %385 : vector<16x128xf32>
      %cst_140 = arith.constant -1.800000e+01 : f32
      %387 = vector.broadcast %cst_140 : f32 to vector<16x128xf32>
      %388 = arith.mulf %387, %386 : vector<16x128xf32>
      %cst_141 = arith.constant -1.56596816 : f32
      %389 = vector.broadcast %cst_141 : f32 to vector<16x128xf32>
      %390 = arith.cmpf olt, %388, %389 : vector<16x128xf32>
      %cst_142 = arith.constant 1.000000e-01 : f32
      %cst_143 = arith.constant 1.000000e+00 : f32
      %391 = vector.broadcast %cst_142 : f32 to vector<16x128xf32>
      %392 = vector.broadcast %cst_143 : f32 to vector<16x128xf32>
      %393 = arith.select %390, %391, %392 : vector<16x128xi1>, vector<16x128xf32>
      %394 = math.exp %388 : vector<16x128xf32>
      %395 = arith.mulf %394, %393 : vector<16x128xf32>
      %396 = arith.mulf %395, %384 : vector<16x128xf32>
      %397 = arith.addf %382, %396 : vector<16x128xf32>
      %398 = arith.addf %383, %395 : vector<16x128xf32>
      %399 = vector.extract_strided_slice %353 {offsets = [3, 0], sizes = [16, 128], strides = [1, 1]} : vector<24x128xf32> to vector<16x128xf32>
      %400 = arith.subf %arg5, %399 : vector<16x128xf32>
      %401 = arith.mulf %400, %400 : vector<16x128xf32>
      %cst_144 = arith.constant -1.800000e+01 : f32
      %402 = vector.broadcast %cst_144 : f32 to vector<16x128xf32>
      %403 = arith.mulf %402, %401 : vector<16x128xf32>
      %cst_145 = arith.constant -1.56596816 : f32
      %404 = vector.broadcast %cst_145 : f32 to vector<16x128xf32>
      %405 = arith.cmpf olt, %403, %404 : vector<16x128xf32>
      %cst_146 = arith.constant 1.000000e-01 : f32
      %cst_147 = arith.constant 1.000000e+00 : f32
      %406 = vector.broadcast %cst_146 : f32 to vector<16x128xf32>
      %407 = vector.broadcast %cst_147 : f32 to vector<16x128xf32>
      %408 = arith.select %405, %406, %407 : vector<16x128xi1>, vector<16x128xf32>
      %409 = math.exp %403 : vector<16x128xf32>
      %410 = arith.mulf %409, %408 : vector<16x128xf32>
      %411 = arith.mulf %410, %399 : vector<16x128xf32>
      %412 = arith.addf %397, %411 : vector<16x128xf32>
      %413 = arith.addf %398, %410 : vector<16x128xf32>
      %414 = vector.extract_strided_slice %353 {offsets = [4, 0], sizes = [16, 128], strides = [1, 1]} : vector<24x128xf32> to vector<16x128xf32>
      %415 = arith.subf %arg5, %414 : vector<16x128xf32>
      %416 = arith.mulf %415, %415 : vector<16x128xf32>
      %cst_148 = arith.constant -1.800000e+01 : f32
      %417 = vector.broadcast %cst_148 : f32 to vector<16x128xf32>
      %418 = arith.mulf %417, %416 : vector<16x128xf32>
      %cst_149 = arith.constant -1.56596816 : f32
      %419 = vector.broadcast %cst_149 : f32 to vector<16x128xf32>
      %420 = arith.cmpf olt, %418, %419 : vector<16x128xf32>
      %cst_150 = arith.constant 1.000000e-01 : f32
      %cst_151 = arith.constant 1.000000e+00 : f32
      %421 = vector.broadcast %cst_150 : f32 to vector<16x128xf32>
      %422 = vector.broadcast %cst_151 : f32 to vector<16x128xf32>
      %423 = arith.select %420, %421, %422 : vector<16x128xi1>, vector<16x128xf32>
      %424 = math.exp %418 : vector<16x128xf32>
      %425 = arith.mulf %424, %423 : vector<16x128xf32>
      %426 = arith.mulf %425, %414 : vector<16x128xf32>
      %427 = arith.addf %412, %426 : vector<16x128xf32>
      %428 = arith.addf %413, %425 : vector<16x128xf32>
      %c2_i32 = arith.constant 2 : i32
      %429 = tpu.dynamic_rotate %123 by %c2_i32 dim 1 : vector<24x128xf32>, i32 -> vector<24x128xf32>
      %430 = vector.extract_strided_slice %429 {offsets = [0, 0], sizes = [16, 128], strides = [1, 1]} : vector<24x128xf32> to vector<16x128xf32>
      %431 = arith.subf %arg5, %430 : vector<16x128xf32>
      %432 = arith.mulf %431, %431 : vector<16x128xf32>
      %cst_152 = arith.constant -1.800000e+01 : f32
      %433 = vector.broadcast %cst_152 : f32 to vector<16x128xf32>
      %434 = arith.mulf %433, %432 : vector<16x128xf32>
      %cst_153 = arith.constant -1.56596816 : f32
      %435 = vector.broadcast %cst_153 : f32 to vector<16x128xf32>
      %436 = arith.cmpf olt, %434, %435 : vector<16x128xf32>
      %cst_154 = arith.constant 1.000000e-01 : f32
      %cst_155 = arith.constant 1.000000e+00 : f32
      %437 = vector.broadcast %cst_154 : f32 to vector<16x128xf32>
      %438 = vector.broadcast %cst_155 : f32 to vector<16x128xf32>
      %439 = arith.select %436, %437, %438 : vector<16x128xi1>, vector<16x128xf32>
      %440 = math.exp %434 : vector<16x128xf32>
      %441 = arith.mulf %440, %439 : vector<16x128xf32>
      %442 = arith.mulf %441, %430 : vector<16x128xf32>
      %443 = arith.addf %427, %442 : vector<16x128xf32>
      %444 = arith.addf %428, %441 : vector<16x128xf32>
      %445 = vector.extract_strided_slice %429 {offsets = [1, 0], sizes = [16, 128], strides = [1, 1]} : vector<24x128xf32> to vector<16x128xf32>
      %446 = arith.subf %arg5, %445 : vector<16x128xf32>
      %447 = arith.mulf %446, %446 : vector<16x128xf32>
      %cst_156 = arith.constant -1.800000e+01 : f32
      %448 = vector.broadcast %cst_156 : f32 to vector<16x128xf32>
      %449 = arith.mulf %448, %447 : vector<16x128xf32>
      %cst_157 = arith.constant -1.56596816 : f32
      %450 = vector.broadcast %cst_157 : f32 to vector<16x128xf32>
      %451 = arith.cmpf olt, %449, %450 : vector<16x128xf32>
      %cst_158 = arith.constant 1.000000e-01 : f32
      %cst_159 = arith.constant 1.000000e+00 : f32
      %452 = vector.broadcast %cst_158 : f32 to vector<16x128xf32>
      %453 = vector.broadcast %cst_159 : f32 to vector<16x128xf32>
      %454 = arith.select %451, %452, %453 : vector<16x128xi1>, vector<16x128xf32>
      %455 = math.exp %449 : vector<16x128xf32>
      %456 = arith.mulf %455, %454 : vector<16x128xf32>
      %457 = arith.mulf %456, %445 : vector<16x128xf32>
      %458 = arith.addf %443, %457 : vector<16x128xf32>
      %459 = arith.addf %444, %456 : vector<16x128xf32>
      %460 = vector.extract_strided_slice %429 {offsets = [2, 0], sizes = [16, 128], strides = [1, 1]} : vector<24x128xf32> to vector<16x128xf32>
      %461 = arith.subf %arg5, %460 : vector<16x128xf32>
      %462 = arith.mulf %461, %461 : vector<16x128xf32>
      %cst_160 = arith.constant -1.800000e+01 : f32
      %463 = vector.broadcast %cst_160 : f32 to vector<16x128xf32>
      %464 = arith.mulf %463, %462 : vector<16x128xf32>
      %cst_161 = arith.constant -1.56596816 : f32
      %465 = vector.broadcast %cst_161 : f32 to vector<16x128xf32>
      %466 = arith.cmpf olt, %464, %465 : vector<16x128xf32>
      %cst_162 = arith.constant 1.000000e-01 : f32
      %cst_163 = arith.constant 1.000000e+00 : f32
      %467 = vector.broadcast %cst_162 : f32 to vector<16x128xf32>
      %468 = vector.broadcast %cst_163 : f32 to vector<16x128xf32>
      %469 = arith.select %466, %467, %468 : vector<16x128xi1>, vector<16x128xf32>
      %470 = math.exp %464 : vector<16x128xf32>
      %471 = arith.mulf %470, %469 : vector<16x128xf32>
      %472 = arith.mulf %471, %460 : vector<16x128xf32>
      %473 = arith.addf %458, %472 : vector<16x128xf32>
      %474 = arith.addf %459, %471 : vector<16x128xf32>
      %475 = vector.extract_strided_slice %429 {offsets = [3, 0], sizes = [16, 128], strides = [1, 1]} : vector<24x128xf32> to vector<16x128xf32>
      %476 = arith.subf %arg5, %475 : vector<16x128xf32>
      %477 = arith.mulf %476, %476 : vector<16x128xf32>
      %cst_164 = arith.constant -1.800000e+01 : f32
      %478 = vector.broadcast %cst_164 : f32 to vector<16x128xf32>
      %479 = arith.mulf %478, %477 : vector<16x128xf32>
      %cst_165 = arith.constant -1.56596816 : f32
      %480 = vector.broadcast %cst_165 : f32 to vector<16x128xf32>
      %481 = arith.cmpf olt, %479, %480 : vector<16x128xf32>
      %cst_166 = arith.constant 1.000000e-01 : f32
      %cst_167 = arith.constant 1.000000e+00 : f32
      %482 = vector.broadcast %cst_166 : f32 to vector<16x128xf32>
      %483 = vector.broadcast %cst_167 : f32 to vector<16x128xf32>
      %484 = arith.select %481, %482, %483 : vector<16x128xi1>, vector<16x128xf32>
      %485 = math.exp %479 : vector<16x128xf32>
      %486 = arith.mulf %485, %484 : vector<16x128xf32>
      %487 = arith.mulf %486, %475 : vector<16x128xf32>
      %488 = arith.addf %473, %487 : vector<16x128xf32>
      %489 = arith.addf %474, %486 : vector<16x128xf32>
      %490 = vector.extract_strided_slice %429 {offsets = [4, 0], sizes = [16, 128], strides = [1, 1]} : vector<24x128xf32> to vector<16x128xf32>
      %491 = arith.subf %arg5, %490 : vector<16x128xf32>
      %492 = arith.mulf %491, %491 : vector<16x128xf32>
      %cst_168 = arith.constant -1.800000e+01 : f32
      %493 = vector.broadcast %cst_168 : f32 to vector<16x128xf32>
      %494 = arith.mulf %493, %492 : vector<16x128xf32>
      %cst_169 = arith.constant -1.56596816 : f32
      %495 = vector.broadcast %cst_169 : f32 to vector<16x128xf32>
      %496 = arith.cmpf olt, %494, %495 : vector<16x128xf32>
      %cst_170 = arith.constant 1.000000e-01 : f32
      %cst_171 = arith.constant 1.000000e+00 : f32
      %497 = vector.broadcast %cst_170 : f32 to vector<16x128xf32>
      %498 = vector.broadcast %cst_171 : f32 to vector<16x128xf32>
      %499 = arith.select %496, %497, %498 : vector<16x128xi1>, vector<16x128xf32>
      %500 = math.exp %494 : vector<16x128xf32>
      %501 = arith.mulf %500, %499 : vector<16x128xf32>
      %502 = arith.mulf %501, %490 : vector<16x128xf32>
      %503 = arith.addf %488, %502 : vector<16x128xf32>
      %504 = arith.addf %489, %501 : vector<16x128xf32>
      %505 = arith.divf %503, %504 : vector<16x128xf32>
      scf.yield %505 : vector<16x128xf32>
    }
    %c0_17 = arith.constant 0 : index
    %c2_18 = arith.constant 2 : index
    %c0_19 = arith.constant 0 : index
    %25 = vector.load %arg2[%c0_17, %c2_18, %c0_19] : memref<1x24x128xf32, #tpu.memory_space<vmem>>, vector<1x16x128xf32>
    %26 = vector.shape_cast %25 : vector<1x16x128xf32> to vector<16x128xf32>
    %27 = vector.shape_cast %24 : vector<16x128xf32> to vector<1x16x128xf32>
    tpu.vector_store %arg2[%c0_17, %c2_18, %c0_19], %27 {strides = array<i32>} : memref<1x24x128xf32, #tpu.memory_space<vmem>>, vector<1x16x128xf32>,
    %cst_20 = arith.constant 5.100000e-01 : f32
    %28 = vector.broadcast %cst_20 : f32 to vector<16x128xf32>
    %29 = arith.divf %24, %28 : vector<16x128xf32>
    %30 = math.roundeven %29 : vector<16x128xf32>
    %31 = arith.fptosi %30 : vector<16x128xf32> to vector<16x128xi32>
    %c0_21 = arith.constant 0 : index
    %c0_22 = arith.constant 0 : index
    %c0_23 = arith.constant 0 : index
    %32 = vector.load %arg3[%c0_21, %c0_22, %c0_23] : memref<1x16x128xi32, #tpu.memory_space<vmem>>, vector<1x16x128xi32>
    %33 = vector.shape_cast %32 : vector<1x16x128xi32> to vector<16x128xi32>
    %34 = vector.shape_cast %31 : vector<16x128xi32> to vector<1x16x128xi32>
    tpu.vector_store %arg3[%c0_21, %c0_22, %c0_23], %34 {strides = array<i32>} : memref<1x16x128xi32, #tpu.memory_space<vmem>>, vector<1x16x128xi32>,
    return
  }
  func.func @transform_0(%arg0: i32) -> (i32, i32, i32) {
    %c0_i32 = arith.constant 0 : i32
    %c0_i32_0 = arith.constant 0 : i32
    %c0_i32_1 = arith.constant 0 : i32
    return %arg0, %c0_i32, %c0_i32_0 : i32, i32, i32
  }
  func.func @transform_1(%arg0: i32) -> (i32, i32, i32) {
    %c0_i32 = arith.constant 0 : i32
    %c0_i32_0 = arith.constant 0 : i32
    %c0_i32_1 = arith.constant 0 : i32
    return %arg0, %c0_i32, %c0_i32_0 : i32, i32, i32
  }
  func.func @transform_2(%arg0: i32) -> (i32, i32, i32) {
    %c0_i32 = arith.constant 0 : i32
    %c0_i32_0 = arith.constant 0 : i32
    %c0_i32_1 = arith.constant 0 : i32
    return %arg0, %c0_i32, %c0_i32_0 : i32, i32, i32
  }
}

</mosaic_0001>

<bundles_post_ra>
// kernel: tpu_custom_call.1
= control target key start
LH: loop header
LB: loop body
LE: loop exit
PB: predicated region body
PF: predicated region fallthrough
CT: control target
= control target key end

     0   :  { %8 = vsyncpa [#allocation3], 0  ;;  %s2087_s0 = inlined_call_operand.hbm [shape: f32[2,16,16], index: 0, kind: input, shape index: {}]   ;;  %s2088_s1 = inlined_call_operand.hbm [shape: f32[1,24,128], index: 1, kind: output, shape index: {0}]   ;;  %s2089_s2 = inlined_call_operand.hbm [shape: s32[1,16,128], index: 2, kind: output, shape index: {1}]  }
   0x1   :  { %9 = vsyncpa [#allocation4], 0 }
   0x2   :  { %10 = vsyncpa [#allocation7], 0  ;;  %s1243_s9 = smov [#allocation2]  }
   0x3   :  { %s16_s10 = sshll.u32 %s1243_s9, 4  ;;  %s17_s10 = int_to_ptr.vmem [resolvable:$true] %s16_s10 }
   0x4   :  { %s1161_s11 = scalar_lea.vmem %s17_s10, 512  ;;  %p1166_p1 = scmp.lt.s32.totalorder %s17_s10, %s17_s10 }
   0x5   :  { %p1162_p0 = scmp.ne.s32.totalorder %s17_s10, %s1161_s11  ;;  %p1167_p2 = scmp.lt.s32.totalorder %s1161_s11, %s1161_s11 }
   0x7   :  { %p1168_p3 = por %p1167_p2, %p1166_p1 }
   0x9   :  { %p1169_p4 = pnand %p1168_p3, %p1162_p0 }
   0xb   :  { %1172 = shalt.err (!%p1169_p4)
}
   0xc   :  { %s1244_s12 = smov 128   ;;  %s1245_s13 = smov 8  }
   0xd   :  { %22 = dma.hbm_to_vmem [thread:$0]  %s2087_s0, 512, %s17_s10, [#allocation3], %s1244_s12, %s1244_s12, %s1245_s13  }
   0xe   :  { %1225 = dma.done.wait [#allocation3], 512  }
   0xf   :  { %1226 = vsyncadd [#allocation3], 4294966784  ;;  %v1246_v0 = vmov 0   ;;  %v1247_v1 = vmov 0.0   ;;  %v31_v2 = vld [vmem:[#allocation2] sm:$0xff]  ;;  %v33_v3 = vld [vmem:[#allocation2 + $0x10] sm:$0xff] }
  0x10   :  { %29 = vst [vmem:[#allocation6] sm:$0xff] %v1246_v0  ;;  %30 = vst [vmem:[#allocation6 + $0x8] sm:$0xff] %v1246_v0  ;;  %v32_v4 = vld [vmem:[#allocation2 + $0x8] sm:$0xff]  ;;  %v35_v5 = vmax.f32 %v31_v2, 0.0  ;;  %v37_v6 = vmax.f32 %v33_v3, 0.0  ;;  %v34_v7 = vld [vmem:[#allocation2 + $0x18] sm:$0xff] }
  0x11   :  { %26 = vst [vmem:[#allocation5] sm:$0xff] %v1247_v1  ;;  %27 = vst [vmem:[#allocation5 + $0x8] sm:$0xff] %v1247_v1  ;;  %s1248_s16 = smov 2   ;;  %s1249_s17 = smov 22   ;;  %v36_v8 = vmax.f32 %v32_v4, 0.0  ;;  %v38_v9 = vmax.f32 %v34_v7, 0.0 }
  0x12   :  { %28 = vst [vmem:[#allocation5 + $0x10] sm:$0xff] %v1247_v1  ;;  %41 = vrot.lane.b32.xlu0 %v35_v5, %s1248_s16  ;;  %52 = vrot.lane.b32.xlu1 %v37_v6, %s1249_s17  ;;  %vm47_vm0 = vcmask 146448   ;;  %vm58_vm1 = vcmask 310448   ;;  %s1289_s0 = smov 0  }
  0x16   :  { %43 = vrot.lane.b32.xlu0 %v36_v8, %s1248_s16  ;;  %54 = vrot.lane.b32.xlu1 %v38_v9, %s1249_s17 }
  0x84   :  { %v42_v10 = vpop.permute.xlu0 %41  ;;  %v53_v11 = vpop.permute.xlu1 %52 }
  0x85   :  { %48 = vst.msk [vmem:[#allocation5 + $0x2] sm:$0xff] %vm47_vm0, %v42_v10 }
  0x86   :  { %59 = vst.msk [vmem:[#allocation5 + $0x2] sm:$0xff] %vm58_vm1, %v53_v11 }
  0x88   :  { %v44_v12 = vpop.permute.xlu0 %43  ;;  %v55_v13 = vpop.permute.xlu1 %54 }
  0x89   :  { %49 = vst.msk [vmem:[#allocation5 + $0xa] sm:$0xff] %vm47_vm0, %v44_v12 }
  0x8a   :  { %60 = vst.msk [vmem:[#allocation5 + $0xa] sm:$0xff] %vm58_vm1, %v55_v13 }
  0x8d   :  { %v61_v14 = vld [vmem:[#allocation5 + $0x2] sm:$0xff]  }
  0x91   :  { %v62_v15 = vld [vmem:[#allocation5 + $0xa] sm:$0xff]  }
  0x92 LB: > { %v1250_v16 = vmov 2   ;;  %s1251_s18 = smov 126   ;;  %71 = vst [vmem:[#allocation5 + $0x2] sm:$0xff] %v1237_v14  ;;  %v121_v17 = vrot.slane %v1233_v15, 7  ;;  %72 = vst [vmem:[#allocation5 + $0xa] sm:$0xff] %v1233_v15  ;;  %s1252_s19 = smov 111   ;;  %v73_v21 = vlaneseq  ;;  %s1241_s0 = sphi %s1289_s0, %s68_s0   ;;  %v1237_v14 = vphi %v61_v14, %v2129_v14   ;;  %v1233_v15 = vphi %v62_v15, %v2128_v15  }
  0x93   : > { %1043 = vset.pattern.permute.xlu1 %v1250_v16  ;;  %1042 = vset.pattern.permute.xlu0 %v1250_v16  ;;  %s1253_s20 = smov 106   ;;  %s1254_s21 = smov 91   ;;  %v1255_v18 = vmov 17   ;;  %v1256_v19 = vmov 37   ;;  %v1257_v20 = vmov 22   ;;  %vm93_vm2 = vcmask 15360  }
  0x94   : > { %107 = vrot.lane.b32.xlu0 %v1237_v14, %s1251_s18  ;;  %122 = vrot.lane.b32.xlu1 %v121_v17, %s1251_s18  ;;  %v74_v22 = vshrl.u32 %v73_v21, 7  ;;  %vm104_vm3 = vcmask 162960   ;;  %vm142_vm4 = vcmask 179360   ;;  %vm153_vm5 = vcmask 326960   ;;  %s1258_s30 = smov 127   ;;  %s1259_s3 = smov 1  }
  0x95   : > { %vm112_vm6 = vcmask 9216   ;;  %vm119_vm7 = vcmask 156816   ;;  %vm161_vm8 = vcmask 173216   ;;  %vm168_vm9 = vcmask 320816   ;;  %s1260_s4 = smov 2   ;;  %s68_s0 = sadd.s32 1, %s1241_s0  }
  0x96   : > { %v75_v23 = vsub.s32 0, %v74_v22  ;;  %v80_v25 = vsub.s32 7, %v74_v22  ;;  %vm216_vm10 = vcmask 1046528   ;;  %vm246_vm11 = vcmask 1045504   ;;  %p65_p5 = scmp.ge.s32.totalorder %s68_s0, 4  }
  0x97   : > { %vm276_vm12 = vcmask 1044480   ;;  %vm306_vm13 = vcmask 1043456   ;;  %s1262_s5 = smov (%p65_p5), [#allocation5]   ;;  %s1263_s7 = smov (%p65_p5), [#allocation6]  }
  0x98   : > { %114 = vrot.lane.b32.xlu0 %v1237_v14, %s1252_s19  ;;  %128 = vrot.lane.b32.xlu1 %v121_v17, %s1252_s19  ;;  %v76_v24 = vrot.slane %v1237_v14, %v75_v23  ;;  %v81_v26 = vrot.slane %v1233_v15, %v80_v25  ;;  %s936_s6 = sshll.u32 (%p65_p5), %s1262_s5, 4  ;;  %s948_s8 = sshll.u32 (%p65_p5), %s1263_s7, 4  ;;  %s937_s6 = int_to_ptr.vmem [resolvable:$true] %s936_s6  ;;  %s949_s8 = int_to_ptr.vmem [resolvable:$true] %s948_s8 }
  0x99   :  { %s1173_s9 = scalar_lea.vmem (%p65_p5), %s937_s6, 384  ;;  %p1178_p7 = scmp.lt.s32.totalorder (%p65_p5), %s937_s6, %s937_s6 }
  0x9a   : > { %77 = vst [vmem:[#allocation5] sm:$0x3] %v76_v24  ;;  %82 = vst [vmem:[#allocation5 + $0x12] sm:$0x3] %v81_v26  ;;  %p1174_p6 = scmp.ne.s32.totalorder (%p65_p5), %s937_s6, %s1173_s9  ;;  %p1179_p8 = scmp.lt.s32.totalorder (%p65_p5), %s1173_s9, %s1173_s9 }
  0x9c   : > { %156 = vrot.lane.b32.xlu0 %v1237_v14, %s1253_s20  ;;  %163 = vrot.lane.b32.xlu1 %v1237_v14, %s1254_s21  ;;  %p1180_p9 = por (%p65_p5), %p1179_p8, %p1178_p7 }
  0x9e   :  { %p1181_p10 = pnand (%p65_p5), %p1180_p9, %p1174_p6 }
  0xa0   : > { %170 = vrot.lane.b32.xlu0 %v121_v17, %s1253_s20  ;;  %176 = vrot.lane.b32.xlu1 %v121_v17, %s1254_s21 }
  0xa4   : > { %85 = vperm.xlu0 %1042, %v1237_v14   ;;  %90 = vperm.xlu1 %1043, %v1233_v15  }
  0xa8   : > { %1045 = vset.pattern.permute.xlu0 %v1255_v18  ;;  %1044 = vset.pattern.permute.xlu1 %v1255_v18 }
  0xa9   : > { %101 = vperm.xlu0 %1045, %v1233_v15   ;;  %97 = vperm.xlu1 %1044, %v1237_v14  }
  0xad   : > { %1047 = vset.pattern.permute.xlu0 %v1256_v19  ;;  %1046 = vset.pattern.permute.xlu1 %v1257_v20 }
  0xae   : > { %146 = vperm.xlu0 %1047, %v1237_v14   ;;  %135 = vperm.xlu1 %1046, %v1237_v14  }
  0xb2   : > { %139 = vperm.xlu1 %1046, %v1233_v15  }
  0xb6   : > { %1048 = vset.pattern.permute.xlu1 %v1256_v19 }
  0xb7   : > { %150 = vperm.xlu1 %1048, %v1233_v15  }
 0x106   : > { %v108_v27 = vpop.permute.xlu0 %107  ;;  %v123_v28 = vpop.permute.xlu1 %122 }
 0x107   : > { %975 = vpush %v108_v27 }
 0x10a   : > { %v115_v29 = vpop.permute.xlu0 %114  ;;  %v129_v30 = vpop.permute.xlu1 %128 }
 0x10b   : > { %977 = vpush %v115_v29 }
 0x10c   : > { %979 = vpush %v123_v28 }
 0x10d   : > { %981 = vpush %v129_v30 }
 0x10e   : > { %v157_v31 = vpop.permute.xlu0 %156  ;;  %v164_v32 = vpop.permute.xlu1 %163 }
 0x10f   : > { %983 = vpush %v157_v31 }
 0x110   : > { %985 = vpush %v164_v32 }
 0x112   : > { %v171_v33 = vpop.permute.xlu0 %170  ;;  %v177_v34 = vpop.permute.xlu1 %176 }
 0x113   : > { %987 = vpush %v171_v33 }
 0x114   : > { %989 = vpush %v177_v34  ;;  %v2096_v34 = vmov 1.0  }
 0x11f   : > { %v86_v35 = vpop.permute.xlu0 %85  ;;  %v91_v36 = vpop.permute.xlu1 %90 }
 0x120   : > { %94 = vst.msk [vmem:[#allocation5 + $0x2] sm:$0xff] %vm93_vm2, %v86_v35  ;;  %95 = vst.msk [vmem:[#allocation5 + $0xa] sm:$0xff] %vm93_vm2, %v91_v36 }
 0x124   : > { %v102_v37 = vpop.permute.xlu0 %101  ;;  %v98_v38 = vpop.permute.xlu1 %97 }
 0x125   : > { %106 = vst.msk [vmem:[#allocation5 + $0xa] sm:$0xff] %vm104_vm3, %v102_v37  ;;  %105 = vst.msk [vmem:[#allocation5 + $0x2] sm:$0xff] %vm104_vm3, %v98_v38 }
 0x129   : > { %v147_v39 = vpop.permute.xlu0 %146  ;;  %v136_v40 = vpop.permute.xlu1 %135 }
 0x12a   : > { %143 = vst.msk [vmem:[#allocation5 + $0x2] sm:$0xff] %vm142_vm4, %v136_v40 }
 0x12b   : > { %154 = vst.msk [vmem:[#allocation5 + $0x2] sm:$0xff] %vm153_vm5, %v147_v39 }
 0x12d   : > { %v140_v41 = vpop.permute.xlu1 %139 }
 0x12e   : > { %144 = vst.msk [vmem:[#allocation5 + $0xa] sm:$0xff] %vm142_vm4, %v140_v41 }
 0x132   : > { %v151_v42 = vpop.permute.xlu1 %150 }
 0x133   : > { %155 = vst.msk [vmem:[#allocation5 + $0xa] sm:$0xff] %vm153_vm5, %v151_v42 }
 0x138   : > { %s976_s22 = spop %975 }
 0x139   : > { %v110_v43 = vstv %s976_s22 }
 0x13a   : > { %113 = vst.msk [vmem:[#allocation5] sm:$0x3] %vm112_vm6, %v110_v43  ;;  %v1319_v44 = vld [vmem:[#allocation5 + $0x8] sm:$0xff] }
 0x13b   : > { %187 = vrot.lane.b32.xlu0 %v1319_v44, %s1251_s18  ;;  %v509_v52 = vrot.slane %v1319_v44, 1  ;;  %v538_v53 = vrot.slane %v1319_v44, 2  ;;  %v567_v54 = vrot.slane %v1319_v44, 3  ;;  %v596_v56 = vrot.slane %v1319_v44, 4 }
 0x13c   : > { %s978_s23 = spop %977  ;;  %v484_v10 = vsub.f32 %v1233_v15, %v1319_v44 }
 0x13d   : > { %v117_v45 = vstv %s978_s23  ;;  %s980_s24 = spop %979 }
 0x13e   : > { %120 = vst.msk [vmem:[#allocation5] sm:$0x3] %vm119_vm7, %v117_v45  ;;  %v125_v46 = vstv %s980_s24  ;;  %s982_s25 = spop %981  ;;  %v486_v11 = vmul.f32 %v484_v10, %v484_v10 }
 0x13f   : > { %127 = vst.msk [vmem:[#allocation5 + $0x12] sm:$0x3] %vm112_vm6, %v125_v46  ;;  %v131_v47 = vstv %s982_s25 }
 0x140   : > { %133 = vst.msk [vmem:[#allocation5 + $0x12] sm:$0x3] %vm119_vm7, %v131_v47  ;;  %s984_s26 = spop %983  ;;  %v488_v12 = vmul.f32 -18.0, %v486_v11 }
 0x141   : > { %v159_v48 = vstv %s984_s26  ;;  %s986_s27 = spop %985 }
 0x142   : > { %162 = vst.msk [vmem:[#allocation5] sm:$0x3] %vm161_vm8, %v159_v48  ;;  %v166_v49 = vstv %s986_s27  ;;  %v495_v13 = vmul.f32 1.442695, %v488_v12  ;;  %vm490_vm14 = vcmp.lt.f32.partialorder %v488_v12, -1.5659682 }
 0x143   : > { %169 = vst.msk [vmem:[#allocation5] sm:$0x3] %vm168_vm9, %v166_v49  ;;  %v492_v35 = vsel %vm490_vm14, 0.1, %v2096_v34 }
 0x144   : > { %s988_s28 = spop %987  ;;  %1049 = vpow2.f32 %v495_v13 }
 0x145   : > { %v173_v50 = vstv %s988_s28  ;;  %s990_s29 = spop %989 }
 0x146   : > { %175 = vst.msk [vmem:[#allocation5 + $0x12] sm:$0x3] %vm161_vm8, %v173_v50  ;;  %v179_v51 = vstv %s990_s29 }
 0x147   : > { %181 = vst.msk [vmem:[#allocation5 + $0x12] sm:$0x3] %vm168_vm9, %v179_v51 }
 0x14a   : > { %v1326_v55 = vld [vmem:[#allocation5] sm:$0xff] }
 0x14b   : > { %185 = vrot.lane.b32.xlu1 %v1326_v55, %s1251_s18  ;;  %336 = vrot.lane.b32.xlu0 %v1326_v55, %s1258_s30  ;;  %v508_v57 = vrot.slane %v1326_v55, 1  ;;  %v537_v58 = vrot.slane %v1326_v55, 2  ;;  %v566_v59 = vrot.slane %v1326_v55, 3  ;;  %v595_v60 = vrot.slane %v1326_v55, 4 }
 0x14c   : > { %v483_v16 = vsub.f32 %v1237_v14, %v1326_v55 }
 0x14d   : > { %v1337_v61 = vsel %vm216_vm10, %v508_v57, %v509_v52  ;;  %v1340_v62 = vsel %vm246_vm11, %v537_v58, %v538_v53  ;;  %v1343_v63 = vsel %vm276_vm12, %v566_v59, %v567_v54  ;;  %v1346_v1 = vsel %vm306_vm13, %v595_v60, %v596_v56 }
 0x14e   : > { %2098 = vst [vmem:[#allocation11_spill] sm:$0xff] %v1343_v63  ;;  %v184_v0 = vld [vmem:[#allocation5 + $0x10] sm:$0xff]  ;;  %2099 = vst [vmem:[#allocation12_spill] sm:$0xff] %v1346_v1  ;;  %v515_v17 = vsub.f32 %v1237_v14, %v1337_v61  ;;  %v485_v18 = vmul.f32 %v483_v16, %v483_v16  ;;  %v544_v20 = vsub.f32 %v1237_v14, %v1340_v62 }
 0x14f   : > { %189 = vrot.lane.b32.xlu1 %v184_v0, %s1251_s18  ;;  %340 = vrot.lane.b32.xlu0 %v184_v0, %s1258_s30  ;;  %v511_v2 = vrot.slane %v184_v0, 1  ;;  %v540_v3 = vrot.slane %v184_v0, 2  ;;  %v569_v4 = vrot.slane %v184_v0, 3  ;;  %v598_v5 = vrot.slane %v184_v0, 4 }
 0x150   : > { %v517_v19 = vmul.f32 %v515_v17, %v515_v17  ;;  %v487_v22 = vmul.f32 -18.0, %v485_v18  ;;  %v546_v25 = vmul.f32 %v544_v20, %v544_v20  ;;  %v573_v40 = vsub.f32 %v1237_v14, %v1343_v63 }
 0x151   : > { %v1350_v6 = vsel %vm216_vm10, %v509_v52, %v511_v2  ;;  %v1353_v7 = vsel %vm246_vm11, %v538_v53, %v540_v3  ;;  %v1358_v8 = vsel %vm276_vm12, %v567_v54, %v569_v4  ;;  %v1361_v9 = vsel %vm306_vm13, %v596_v56, %v598_v5  ;;  %v1050_v33 = vpop.eup %1049 }
 0x152   : > { %2100 = vst [vmem:[#allocation13_spill] sm:$0xff] %v1361_v9  ;;  %v516_v21 = vsub.f32 %v1233_v15, %v1350_v6  ;;  %v545_v23 = vsub.f32 %v1233_v15, %v1353_v7  ;;  %v519_v24 = vmul.f32 -18.0, %v517_v19  ;;  %v493_v27 = vmul.f32 1.442695, %v487_v22 }
 0x153   : > { %338 = vrot.lane.b32.xlu1 %v1319_v44, %s1258_s30  ;;  %626 = vrot.lane.b32.xlu0 %v1319_v44, %s1259_s3  ;;  %v574_v30 = vsub.f32 %v1233_v15, %v1358_v8  ;;  %v548_v32 = vmul.f32 -18.0, %v546_v25  ;;  %v603_v37 = vsub.f32 %v1233_v15, %v1361_v9  ;;  %v1389_v41 = vmul.f32 %v1050_v33, %v492_v35 }
 0x154   : > { %v518_v26 = vmul.f32 %v516_v21, %v516_v21  ;;  %v547_v28 = vmul.f32 %v545_v23, %v545_v23  ;;  %v525_v31 = vmul.f32 1.442695, %v519_v24  ;;  %1051 = vpow2.f32 %v493_v27 }
 0x155   : > { %2101 = vst [vmem:[#allocation14_spill] sm:$0xff] %v1389_v41  ;;  %v576_v42 = vmul.f32 %v574_v30, %v574_v30  ;;  %v554_v43 = vmul.f32 1.442695, %v548_v32  ;;  %vm489_vm15 = vcmp.lt.f32.partialorder %v487_v22, -1.5659682  ;;  %v605_v46 = vmul.f32 %v603_v37, %v603_v37 }
 0x156   : > { %v520_v36 = vmul.f32 -18.0, %v518_v26  ;;  %v549_v39 = vmul.f32 -18.0, %v547_v28  ;;  %1053 = vpow2.f32 %v525_v31  ;;  %vm521_vm1 = vcmp.lt.f32.partialorder %v519_v24, -1.5659682 }
 0x157   : > { %624 = vrot.lane.b32.xlu1 %v1326_v55, %s1259_s3  ;;  %771 = vrot.lane.b32.xlu0 %v1326_v55, %s1260_s4  ;;  %v602_v47 = vsub.f32 %v1237_v14, %v1346_v1  ;;  %v575_v49 = vmul.f32 %v573_v40, %v573_v40  ;;  %v491_v50 = vsel %vm489_vm15, 0.1, %v2096_v34  ;;  %v1396_v51 = vmul.f32 %v1389_v41, %v1319_v44 }
 0x158   : > { %v527_v45 = vmul.f32 1.442695, %v520_v36  ;;  %vm522_vm0 = vcmp.lt.f32.partialorder %v520_v36, -1.5659682  ;;  %vm551_vm2 = vcmp.lt.f32.partialorder %v549_v39, -1.5659682  ;;  %1055 = vpow2.f32 %v554_v43 }
 0x159   : > { %2102 = vst [vmem:[#allocation15_spill] sm:$0xff] %v1396_v51  ;;  %v578_v52 = vmul.f32 -18.0, %v576_v42  ;;  %v1399_v53 = vsel %vm522_vm0, 0.1, %v2096_v34  ;;  %v523_v54 = vsel %vm521_vm1, 0.1, %v2096_v34  ;;  %v604_v59 = vmul.f32 %v602_v47, %v602_v47 }
 0x15a   : > { %1057 = vpow2.f32 %v527_v45  ;;  %vm550_vm3 = vcmp.lt.f32.partialorder %v548_v32, -1.5659682  ;;  %v1403_v56 = vsel %vm551_vm2, 0.1, %v2096_v34  ;;  %v556_v57 = vmul.f32 1.442695, %v549_v39 }
 0x15b   : > { %628 = vrot.lane.b32.xlu1 %v184_v0, %s1259_s3  ;;  %775 = vrot.lane.b32.xlu0 %v184_v0, %s1260_s4  ;;  %v607_v58 = vmul.f32 -18.0, %v605_v46  ;;  %v585_v5 = vmul.f32 1.442695, %v578_v52  ;;  %v552_v10 = vsel %vm550_vm3, 0.1, %v2096_v34  ;;  %v577_v11 = vmul.f32 -18.0, %v575_v49 }
 0x15c   : > { %1059 = vpow2.f32 %v556_v57  ;;  %vm580_vm4 = vcmp.lt.f32.partialorder %v578_v52, -1.5659682  ;;  %v606_v19 = vmul.f32 -18.0, %v604_v59 }
 0x15d   : > { %vm609_vm5 = vcmp.lt.f32.partialorder %v607_v58, -1.5659682  ;;  %1061 = vpow2.f32 %v585_v5  ;;  %v614_v31 = vmul.f32 1.442695, %v607_v58  ;;  %vm579_vm6 = vcmp.lt.f32.partialorder %v577_v11, -1.5659682 }
 0x15e   : > { %v583_v36 = vmul.f32 1.442695, %v577_v11  ;;  %vm608_vm7 = vcmp.lt.f32.partialorder %v606_v19, -1.5659682  ;;  %v1461_v47 = vsel %vm580_vm4, 0.1, %v2096_v34 }
 0x15f   : > { %773 = vrot.lane.b32.xlu1 %v1319_v44, %s1260_s4  ;;  %v1469_v49 = vsel %vm579_vm6, 0.1, %v2096_v34  ;;  %v1481_v5 = vsel %vm608_vm7, 0.1, %v2096_v34 }
 0x160   : > { %2105 = vst [vmem:[#allocation18_spill] sm:$0xff] %v1469_v49  ;;  %2107 = vst [vmem:[#allocation20_spill] sm:$0xff] %v1481_v5 }
 0x161   : > { %v1052_v24 = vpop.eup %1051 }
 0x162   : > { %v1447_v37 = vmul.f32 %v1052_v24, %v491_v50 }
 0x163   : > { %v1054_v28 = vpop.eup %1053 }
 0x164   : > { %2103 = vst [vmem:[#allocation16_spill] sm:$0xff] %v1447_v37  ;;  %v1455_v43 = vmul.f32 %v1054_v28, %v523_v54  ;;  %v1477_v58 = vmul.f32 %v1447_v37, %v1326_v55 }
 0x165   : > { %v1056_v45 = vpop.eup %1055 }
 0x166   : > { %2104 = vst [vmem:[#allocation17_spill] sm:$0xff] %v1455_v43  ;;  %2106 = vst [vmem:[#allocation19_spill] sm:$0xff] %v1477_v58 }
 0x167   : > { %v1058_v50 = vpop.eup %1057 }
 0x1ad   : > { %v1378_v29 = vpop.permute.xlu0 %187 }
 0x1ae   : > { %v192_v38 = vsub.f32 %v1233_v15, %v1378_v29  ;;  %v218_v44 = vrot.slane %v1378_v29, 1  ;;  %v248_v0 = vrot.slane %v1378_v29, 2  ;;  %v278_v2 = vrot.slane %v1378_v29, 3 }
 0x1af   : > { %v308_v3 = vrot.slane %v1378_v29, 4 }
 0x1b0   : > { %v194_v48 = vmul.f32 %v192_v38, %v192_v38  ;;  %v612_v38 = vmul.f32 1.442695, %v606_v19 }
 0x1b2   : > { %v1405_v60 = vmul.f32 -18.0, %v194_v48  ;;  %v1465_v48 = vsel %vm609_vm5, 0.1, %v2096_v34 }
 0x1b4   : > { %v203_v20 = vmul.f32 1.442695, %v1405_v60  ;;  %vm198_vm8 = vcmp.lt.f32.partialorder %v1405_v60, -1.5659682 }
 0x1b6   : > { %1063 = vpow2.f32 %v203_v20 }
 0x1b7   : > { %1065 = vpow2.f32 %v614_v31 }
 0x1b8   : > { %1067 = vpow2.f32 %v583_v36 }
 0x1b9   : > { %1069 = vpow2.f32 %v612_v38 }
 0x1bd   : > { %v1411_v4 = vpop.permute.xlu1 %185  ;;  %v1457_v46 = vpop.permute.xlu0 %336 }
 0x1be   : > { %v191_v12 = vsub.f32 %v1237_v14, %v1411_v4  ;;  %v217_v13 = vrot.slane %v1411_v4, 1  ;;  %v247_v16 = vrot.slane %v1411_v4, 2  ;;  %v277_v17 = vrot.slane %v1411_v4, 3 }
 0x1bf   : > { %v307_v18 = vrot.slane %v1411_v4, 4  ;;  %v342_v60 = vsub.f32 %v1237_v14, %v1457_v46  ;;  %v367_v55 = vrot.slane %v1457_v46, 1 }
 0x1c0   : > { %v1424_v21 = vsel %vm216_vm10, %v217_v13, %v218_v44  ;;  %v1429_v22 = vsel %vm246_vm11, %v247_v16, %v248_v0  ;;  %v1434_v23 = vsel %vm276_vm12, %v277_v17, %v278_v2  ;;  %v193_v25 = vmul.f32 %v191_v12, %v191_v12 }
 0x1c1   : > { %v224_v26 = vsub.f32 %v1237_v14, %v1424_v21  ;;  %v254_v27 = vsub.f32 %v1237_v14, %v1429_v22  ;;  %v1443_v30 = vsel %vm306_vm13, %v307_v18, %v308_v3  ;;  %v284_v35 = vsub.f32 %v1237_v14, %v1434_v23  ;;  %v190_v59 = vpop.permute.xlu1 %189 }
 0x1c2   : > { %v1449_v39 = vmul.f32 -18.0, %v193_v25  ;;  %v314_v42 = vsub.f32 %v1237_v14, %v1443_v30  ;;  %v1488_v13 = vmul.f32 %v1455_v43, %v1337_v61  ;;  %v200_v16 = vsel %vm198_vm8, 0.1, %v2096_v34 }
 0x1c3   : > { %v226_v32 = vmul.f32 %v224_v26, %v224_v26  ;;  %v256_v33 = vmul.f32 %v254_v27, %v254_v27  ;;  %v286_v57 = vmul.f32 %v284_v35, %v284_v35  ;;  %v1493_v17 = vmul.f32 %v1058_v50, %v1399_v53  ;;  %v1501_v26 = vpop.eup %1059 }
 0x1c4   : > { %v201_v11 = vmul.f32 1.442695, %v1449_v39  ;;  %v316_v12 = vmul.f32 %v314_v42, %v314_v42  ;;  %2108 = vst [vmem:[#allocation21_spill] sm:$0xff] %v1488_v13  ;;  %v1495_v18 = vmul.f32 %v1056_v45, %v552_v10  ;;  %v220_v25 = vrot.slane %v190_v59, 1  ;;  %v1529_v38 = vpop.eup %1061 }
 0x1c5   : > { %v1451_v40 = vmul.f32 -18.0, %v226_v32  ;;  %v1472_v54 = vmul.f32 -18.0, %v256_v33  ;;  %v1498_v20 = vmul.f32 -18.0, %v286_v57  ;;  %v250_v61 = vrot.slane %v190_v59, 2 }
 0x1c6   : > { %v280_v27 = vrot.slane %v190_v59, 3  ;;  %v310_v28 = vrot.slane %v190_v59, 4  ;;  %v1503_v31 = vmul.f32 -18.0, %v316_v12  ;;  %v344_v53 = vmul.f32 %v342_v60, %v342_v60  ;;  %v1064_v59 = vpop.eup %1063 }
 0x1c7   : > { %v234_v52 = vmul.f32 1.442695, %v1451_v40  ;;  %v264_v19 = vmul.f32 1.442695, %v1472_v54  ;;  %v1508_v10 = vsel %vm216_vm10, %v218_v44, %v220_v25  ;;  %v1515_v33 = vsel %vm246_vm11, %v248_v0, %v250_v61  ;;  %v1527_v44 = vpop.permute.xlu1 %338 }
 0x1c8   : > { %v225_v32 = vsub.f32 %v1233_v15, %v1508_v10  ;;  %v1520_v35 = vsel %vm276_vm12, %v278_v2, %v280_v27  ;;  %v1525_v36 = vsel %vm306_vm13, %v308_v3, %v310_v28  ;;  %v255_v0 = vsub.f32 %v1233_v15, %v1515_v33  ;;  %v1547_v28 = vpop.eup %1065 }
 0x1c9   : > { %1071 = vpow2.f32 %v234_v52  ;;  %v285_v45 = vsub.f32 %v1233_v15, %v1520_v35  ;;  %v315_v2 = vsub.f32 %v1233_v15, %v1525_v36  ;;  %v294_v50 = vmul.f32 1.442695, %v1498_v20  ;;  %v1540_v52 = vpop.permute.xlu0 %340 }
 0x1ca   : > { %1073 = vpow2.f32 %v201_v11  ;;  %v227_v57 = vmul.f32 %v225_v32, %v225_v32  ;;  %v324_v11 = vmul.f32 1.442695, %v1503_v31  ;;  %v257_v12 = vmul.f32 %v255_v0, %v255_v0 }
 0x1cb   : > { %1075 = vpow2.f32 %v264_v19  ;;  %v287_v60 = vmul.f32 %v285_v45, %v285_v45  ;;  %v368_v25 = vrot.slane %v1527_v44, 1  ;;  %vm197_vm9 = vcmp.lt.f32.partialorder %v1449_v39, -1.5659682  ;;  %v1556_v45 = vpop.eup %1067 }
 0x1cc   : > { %v346_v61 = vmul.f32 -18.0, %v344_v53  ;;  %v1545_v27 = vmul.f32 -18.0, %v227_v57  ;;  %v317_v19 = vmul.f32 %v315_v2, %v315_v2  ;;  %v1549_v42 = vmul.f32 -18.0, %v257_v12  ;;  %2109 = vst [vmem:[#allocation22_spill] sm:$0xff] %v1556_v45  ;;  %v1562_v2 = vpop.eup %1069 }
 0x1cd   : > { %v1551_v32 = vmul.f32 -18.0, %v287_v60  ;;  %v370_v3 = vrot.slane %v1540_v52, 1  ;;  %v343_v0 = vsub.f32 %v1233_v15, %v1527_v44  ;;  %v1558_v24 = vmul.f32 %v1064_v59, %v200_v16  ;;  %2110 = vst [vmem:[#allocation23_spill] sm:$0xff] %v1562_v2 }
 0x1ce   : > { %vm230_vm14 = vcmp.lt.f32.partialorder %v1451_v40, -1.5659682  ;;  %1077 = vpow2.f32 %v294_v50  ;;  %v236_v53 = vmul.f32 1.442695, %v1545_v27  ;;  %v266_v57 = vmul.f32 1.442695, %v1549_v42 }
 0x1cf   : > { %1079 = vpow2.f32 %v324_v11  ;;  %v1566_v12 = vsel %vm216_vm10, %v367_v55, %v368_v25  ;;  %v1569_v60 = vsel %vm216_vm10, %v368_v25, %v370_v3  ;;  %vm260_vm15 = vcmp.lt.f32.partialorder %v1472_v54, -1.5659682 }
 0x1d0   : > { %vm290_vm0 = vcmp.lt.f32.partialorder %v1498_v20, -1.5659682  ;;  %1081 = vpow2.f32 %v236_v53  ;;  %v1573_v16 = vmul.f32 -18.0, %v317_v19  ;;  %v352_v50 = vmul.f32 1.442695, %v346_v61 }
 0x1d1   : > { %1083 = vpow2.f32 %v266_v57  ;;  %v296_v59 = vmul.f32 1.442695, %v1551_v32  ;;  %v345_v11 = vmul.f32 %v343_v0, %v343_v0  ;;  %vm320_vm1 = vcmp.lt.f32.partialorder %v1503_v31, -1.5659682 }
 0x1d2   : > { %vm348_vm2 = vcmp.lt.f32.partialorder %v346_v61, -1.5659682  ;;  %v374_v55 = vsub.f32 %v1237_v14, %v1566_v12  ;;  %v375_v3 = vsub.f32 %v1233_v15, %v1569_v60  ;;  %v1583_v53 = vmul.f32 %v1558_v24, %v1378_v29 }
 0x1d3   : > { %v199_v19 = vsel %vm197_vm9, 0.1, %v2096_v34  ;;  %v232_v31 = vsel %vm230_vm14, 0.1, %v2096_v34  ;;  %v397_v61 = vrot.slane %v1527_v44, 2  ;;  %1085 = vpow2.f32 %v296_v59 }
 0x1d4   : > { %v262_v57 = vsel %vm260_vm15, 0.1, %v2096_v34  ;;  %v292_v29 = vsel %vm290_vm0, 0.1, %v2096_v34  ;;  %v326_v1 = vmul.f32 1.442695, %v1573_v16  ;;  %1087 = vpow2.f32 %v352_v50 }
 0x1d5   : > { %v322_v39 = vsel %vm320_vm1, 0.1, %v2096_v34  ;;  %v1601_v63 = vsel %vm348_vm2, 0.1, %v2096_v34  ;;  %v1603_v40 = vmul.f32 -18.0, %v345_v11  ;;  %v399_v13 = vrot.slane %v1540_v52, 2 }
 0x1d6   : > { %v1072_v25 = vpop.eup %1071  ;;  %v376_v54 = vmul.f32 %v374_v55, %v374_v55  ;;  %v377_v51 = vmul.f32 %v375_v3, %v375_v3  ;;  %vm231_vm3 = vcmp.lt.f32.partialorder %v1545_v27, -1.5659682  ;;  %vm261_vm4 = vcmp.lt.f32.partialorder %v1549_v42, -1.5659682 }
 0x1d7   : > { %v1074_v0 = vpop.eup %1073  ;;  %v238_v9 = vmul.f32 %v1072_v25, %v232_v31  ;;  %v2111_v20 = vrot.slane %v1457_v46, 2  ;;  %vm291_vm5 = vcmp.lt.f32.partialorder %v1551_v32, -1.5659682  ;;  %1089 = vpow2.f32 %v326_v1 }
 0x1d8   : > { %v1076_v43 = vpop.eup %1075  ;;  %v205_v41 = vmul.f32 %v1074_v0, %v199_v19  ;;  %v1614_v50 = vmul.f32 -18.0, %v376_v54  ;;  %v1617_v11 = vsel %vm246_vm11, %v397_v61, %v399_v13  ;;  %v354_v55 = vmul.f32 1.442695, %v1603_v40 }
 0x1d9   : > { %v1611_v59 = vsel %vm246_vm11, %v2111_v20, %v397_v61  ;;  %v1620_v3 = vmul.f32 -18.0, %v377_v51  ;;  %v404_v19 = vsub.f32 %v1233_v15, %v1617_v11  ;;  %v240_v31 = vmul.f32 %v238_v9, %v1424_v21 }
 0x1da   : > { %v403_v25 = vsub.f32 %v1237_v14, %v1611_v59  ;;  %v268_v0 = vmul.f32 %v1076_v43, %v262_v57  ;;  %v428_v1 = vrot.slane %v1540_v52, 3  ;;  %v457_v54 = vrot.slane %v1540_v52, 4 }
 0x1db   : > { %v1078_v20 = vpop.eup %1077  ;;  %v207_v13 = vmul.f32 %v205_v41, %v1411_v4  ;;  %v233_v51 = vsel %vm231_vm3, 0.1, %v2096_v34  ;;  %v263_v61 = vsel %vm261_vm4, 0.1, %v2096_v34  ;;  %v384_v58 = vmul.f32 1.442695, %v1614_v50 }
 0x1dc   : > { %v1080_v2 = vpop.eup %1079  ;;  %v293_v21 = vsel %vm291_vm5, 0.1, %v2096_v34  ;;  %vm321_vm6 = vcmp.lt.f32.partialorder %v1573_v16, -1.5659682  ;;  %v405_v43 = vmul.f32 %v403_v25, %v403_v25  ;;  %v406_v52 = vmul.f32 %v404_v19, %v404_v19 }
 0x1dd   : > { %v1082_v4 = vpop.eup %1081  ;;  %v244_v57 = vadd.f32 %v238_v9, %v205_v41  ;;  %1091 = vpow2.f32 %v354_v55  ;;  %v386_v27 = vmul.f32 1.442695, %v1620_v3  ;;  %v426_v5 = vrot.slane %v1527_v44, 3 }
 0x1de   : > { %v1084_v42 = vpop.eup %1083  ;;  %v242_v45 = vadd.f32 %v240_v31, %v207_v13  ;;  %v270_v49 = vmul.f32 %v268_v0, %v1429_v22  ;;  %v239_v37 = vmul.f32 %v1082_v4, %v233_v51  ;;  %vm349_vm7 = vcmp.lt.f32.partialorder %v1603_v40, -1.5659682 }
 0x1df   : > { %v1645_v32 = vmul.f32 -18.0, %v405_v43  ;;  %v269_v34 = vmul.f32 %v1084_v42, %v263_v61  ;;  %1093 = vpow2.f32 %v384_v58  ;;  %v1647_v25 = vmul.f32 -18.0, %v406_v52 }
 0x1e0   : > { %v455_v9 = vrot.slane %v1527_v44, 4  ;;  %v241_v41 = vmul.f32 %v239_v37, %v1508_v10  ;;  %v245_v55 = vadd.f32 %v239_v37, %v1558_v24  ;;  %v2112_v19 = vrot.slane %v1457_v46, 3  ;;  %v1086_v13 = vpop.eup %1085 }
 0x1e1   : > { %v1658_v22 = vsel %vm276_vm12, %v426_v5, %v428_v1  ;;  %v298_v51 = vmul.f32 %v1078_v20, %v292_v29  ;;  %v328_v61 = vmul.f32 %v1080_v2, %v322_v39  ;;  %v2113_v58 = vmov 1.0   ;;  %v1088_v52 = vpop.eup %1087 }
 0x1e2   : > { %v1655_v31 = vsel %vm276_vm12, %v2112_v19, %v426_v5  ;;  %v323_v43 = vsel %vm321_vm6, 0.1, %v2113_v58  ;;  %1095 = vpow2.f32 %v386_v27  ;;  %v272_v10 = vadd.f32 %v270_v49, %v242_v45 }
 0x1e3   : > { %v274_v4 = vadd.f32 %v268_v0, %v244_v57  ;;  %v243_v37 = vadd.f32 %v241_v41, %v1583_v53  ;;  %v413_v24 = vmul.f32 1.442695, %v1645_v32  ;;  %v415_v42 = vmul.f32 1.442695, %v1647_v25 }
 0x1e4   : > { %v432_v5 = vsub.f32 %v1237_v14, %v1655_v31  ;;  %v433_v2 = vsub.f32 %v1233_v15, %v1658_v22  ;;  %v2114_v29 = vrot.slane %v1457_v46, 4  ;;  %v271_v49 = vmul.f32 %v269_v34, %v1515_v33  ;;  %v1090_v53 = vpop.eup %1089 }
 0x1e5   : > { %v275_v45 = vadd.f32 %v269_v34, %v245_v55  ;;  %v299_v39 = vmul.f32 %v1086_v13, %v293_v21  ;;  %1097 = vpow2.f32 %v413_v24  ;;  %v1677_v20 = vsel %vm306_vm13, %v455_v9, %v457_v54 }
 0x1e6   : > { %v1673_v16 = vsel %vm306_vm13, %v2114_v29, %v455_v9  ;;  %1099 = vpow2.f32 %v415_v42  ;;  %v434_v0 = vmul.f32 %v432_v5, %v432_v5  ;;  %v435_v1 = vmul.f32 %v433_v2, %v433_v2  ;;  %v1701_v5 = vpop.permute.xlu0 %626 }
 0x1e7   : > { %v300_v57 = vmul.f32 %v298_v51, %v1434_v23  ;;  %v304_v27 = vadd.f32 %v298_v51, %v274_v4  ;;  %v273_v41 = vadd.f32 %v271_v49, %v243_v37  ;;  %v461_v19 = vsub.f32 %v1237_v14, %v1673_v16 }
 0x1e8   : > { %v356_v29 = vmul.f32 %v1088_v52, %v1601_v63  ;;  %v1683_v33 = vmul.f32 -18.0, %v434_v0  ;;  %v1685_v34 = vmul.f32 -18.0, %v435_v1  ;;  %v462_v21 = vsub.f32 %v1233_v15, %v1677_v20 }
 0x1e9   : > { %v302_v55 = vadd.f32 %v300_v57, %v272_v10  ;;  %v301_v54 = vmul.f32 %v299_v39, %v1520_v35  ;;  %v329_v9 = vmul.f32 %v1090_v53, %v323_v43  ;;  %v463_v13 = vmul.f32 %v461_v19, %v461_v19 }
 0x1ea   : > { %v305_v23 = vadd.f32 %v299_v39, %v275_v45  ;;  %v351_v51 = vsel %vm349_vm7, 0.1, %v2113_v58  ;;  %v442_v4 = vmul.f32 1.442695, %v1683_v33  ;;  %v464_v63 = vmul.f32 %v462_v21, %v462_v21  ;;  %v1092_v52 = vpop.eup %1091 }
 0x1eb   : > { %v330_v37 = vmul.f32 %v328_v61, %v1443_v30  ;;  %v334_v24 = vadd.f32 %v328_v61, %v304_v27  ;;  %v303_v42 = vadd.f32 %v301_v54, %v273_v41  ;;  %vm380_vm8 = vcmp.lt.f32.partialorder %v1614_v50, -1.5659682 }
 0x1ec   : > { %1101 = vpow2.f32 %v442_v4  ;;  %v444_v35 = vmul.f32 1.442695, %v1685_v34  ;;  %v1697_v43 = vmul.f32 -18.0, %v463_v13  ;;  %v1699_v10 = vmul.f32 -18.0, %v464_v63  ;;  %v1094_v40 = vpop.eup %1093 }
 0x1ed   : > { %v332_v2 = vadd.f32 %v330_v37, %v302_v55  ;;  %v358_v49 = vmul.f32 %v356_v29, %v1457_v46  ;;  %v331_v45 = vmul.f32 %v329_v9, %v1525_v36  ;;  %vm381_vm9 = vcmp.lt.f32.partialorder %v1620_v3, -1.5659682 }
 0x1ee   : > { %v335_v30 = vadd.f32 %v329_v9, %v305_v23  ;;  %v357_v61 = vmul.f32 %v1092_v52, %v351_v51  ;;  %1103 = vpow2.f32 %v444_v35  ;;  %v471_v39 = vmul.f32 1.442695, %v1697_v43 }
 0x1ef   : > { %v1096_v53 = vpop.eup %1095  ;;  %v362_v0 = vadd.f32 %v356_v29, %v334_v24  ;;  %v382_v1 = vsel %vm380_vm8, 0.1, %v2113_v58  ;;  %vm409_vm14 = vcmp.lt.f32.partialorder %v1645_v32, -1.5659682  ;;  %v631_v46 = vsub.f32 %v1233_v15, %v1701_v5 }
 0x1f0   : > { %v333_v57 = vadd.f32 %v331_v45, %v303_v42  ;;  %v388_v36 = vmul.f32 %v1094_v40, %v382_v1  ;;  %1105 = vpow2.f32 %v471_v39  ;;  %v473_v3 = vmul.f32 1.442695, %v1699_v10 }
 0x1f1   : > { %v360_v27 = vadd.f32 %v358_v49, %v332_v2  ;;  %v383_v41 = vsel %vm381_vm9, 0.1, %v2113_v58  ;;  %vm410_vm15 = vcmp.lt.f32.partialorder %v1647_v25, -1.5659682  ;;  %v1718_v19 = vmul.f32 %v1501_v26, %v1403_v56 }
 0x1f2   : > { %v1098_v50 = vpop.eup %1097  ;;  %v359_v29 = vmul.f32 %v357_v61, %v1527_v44  ;;  %v363_v21 = vadd.f32 %v357_v61, %v335_v30  ;;  %v389_v55 = vmul.f32 %v1096_v53, %v383_v41  ;;  %1107 = vpow2.f32 %v473_v3 }
 0x1f3   : > { %v1100_v54 = vpop.eup %1099  ;;  %v411_v9 = vsel %vm409_vm14, 0.1, %v2113_v58  ;;  %v1726_v13 = vmul.f32 %v1493_v17, %v1350_v6  ;;  %v633_v23 = vmul.f32 %v631_v46, %v631_v46  ;;  %v1730_v56 = vmul.f32 %v1495_v18, %v1340_v62 }
 0x1f4   : > { %v361_v26 = vadd.f32 %v359_v29, %v333_v57  ;;  %v390_v44 = vmul.f32 %v388_v36, %v1566_v12  ;;  %v394_v51 = vadd.f32 %v388_v36, %v362_v0  ;;  %v417_v4 = vmul.f32 %v1098_v50, %v411_v9  ;;  %v1743_v12 = vpop.permute.xlu1 %624 }
 0x1f5   : > { %v412_v63 = vsel %vm410_vm15, 0.1, %v2113_v58  ;;  %vm438_vm0 = vcmp.lt.f32.partialorder %v1683_v33, -1.5659682  ;;  %vm439_vm1 = vcmp.lt.f32.partialorder %v1685_v34, -1.5659682  ;;  %v1740_v6 = vmul.f32 %v1718_v19, %v1353_v7 }
 0x1f6   : > { %v391_v62 = vmul.f32 %v389_v55, %v1569_v60  ;;  %v392_v32 = vadd.f32 %v390_v44, %v360_v27  ;;  %v395_v52 = vadd.f32 %v389_v55, %v363_v21  ;;  %v418_v37 = vmul.f32 %v1100_v54, %v412_v63 }
 0x1f7   : > { %vm467_vm2 = vcmp.lt.f32.partialorder %v1697_v43, -1.5659682  ;;  %v1748_v25 = vmul.f32 %v1529_v38, %v1461_v47  ;;  %v1752_v24 = vmul.f32 %v1547_v28, %v1465_v48  ;;  %v1754_v42 = vmul.f32 -18.0, %v633_v23 }
 0x1f8   : > { %v393_v7 = vadd.f32 %v391_v62, %v361_v26  ;;  %v419_v60 = vmul.f32 %v417_v4, %v1611_v59  ;;  %v423_v35 = vadd.f32 %v417_v4, %v394_v51  ;;  %vm468_vm3 = vcmp.lt.f32.partialorder %v1699_v10, -1.5659682 }
 0x1f9   : > { %v1102_v40 = vpop.eup %1101  ;;  %v440_v2 = vsel %vm438_vm0, 0.1, %v2113_v58  ;;  %v441_v47 = vsel %vm439_vm1, 0.1, %v2113_v58  ;;  %v630_v48 = vsub.f32 %v1237_v14, %v1743_v12  ;;  %v655_v38 = vrot.slane %v1743_v12, 1 }
 0x1fa   : > { %v420_v28 = vmul.f32 %v418_v37, %v1617_v11  ;;  %v421_v59 = vadd.f32 %v419_v60, %v392_v32  ;;  %v424_v49 = vadd.f32 %v418_v37, %v395_v52  ;;  %v446_v45 = vmul.f32 %v1102_v40, %v440_v2  ;;  %v2115_v52 = vld [vmem:[#allocation16_spill] sm:$0xff]  ;;  %v2117_v60 = vld [vmem:[#allocation22_spill] sm:$0xff]  ;;  %v2119_v40 = vld [vmem:[#allocation23_spill] sm:$0xff] }
 0x1fb   : > { %v1104_v10 = vpop.eup %1103  ;;  %v469_v33 = vsel %vm467_vm2, 0.1, %v2113_v58  ;;  %v470_v30 = vsel %vm468_vm3, 0.1, %v2113_v58  ;;  %v1774_v34 = vmul.f32 %v1748_v25, %v1358_v8  ;;  %v656_v61 = vrot.slane %v1701_v5, 1 }
 0x1fc   : > { %v422_v39 = vadd.f32 %v420_v28, %v393_v7  ;;  %v447_v53 = vmul.f32 %v1104_v10, %v441_v47  ;;  %v448_v11 = vmul.f32 %v446_v45, %v1655_v31  ;;  %v452_v0 = vadd.f32 %v446_v45, %v423_v35  ;;  %v2116_v7 = vld [vmem:[#allocation18_spill] sm:$0xff]  ;;  %v2118_v35 = vld [vmem:[#allocation20_spill] sm:$0xff]  ;;  %v2122_v45 = vld [vmem:[#allocation17_spill] sm:$0xff] }
 0x1fd   : > { %v1106_v1 = vpop.eup %1105  ;;  %v642_v46 = vmul.f32 1.442695, %v1754_v42  ;;  %v632_v57 = vmul.f32 %v630_v48, %v630_v48  ;;  %v1782_v43 = vsel %vm216_vm10, %v655_v38, %v656_v61  ;;  %v684_v36 = vrot.slane %v1743_v12, 2  ;;  %v2120_v38 = vld [vmem:[#allocation19_spill] sm:$0xff] }
 0x1fe   : > { %v449_v8 = vmul.f32 %v447_v53, %v1658_v22  ;;  %v450_v3 = vadd.f32 %v448_v11, %v421_v59  ;;  %v453_v27 = vadd.f32 %v447_v53, %v424_v49  ;;  %v475_v41 = vmul.f32 %v1106_v1, %v469_v33  ;;  %v2121_v59 = vld [vmem:[#allocation14_spill] sm:$0xff]  ;;  %v2123_v53 = vld [vmem:[#allocation15_spill] sm:$0xff]  ;;  %v2124_v1 = vld [vmem:[#allocation21_spill] sm:$0xff] }
 0x1ff   : > { %v1108_v50 = vpop.eup %1107  ;;  %v685_v31 = vrot.slane %v1701_v5, 2  ;;  %v714_v29 = vrot.slane %v1701_v5, 3  ;;  %v713_v21 = vrot.slane %v1743_v12, 3  ;;  %v742_v55 = vrot.slane %v1743_v12, 4 }
 0x200   : > { %v451_v54 = vadd.f32 %v449_v8, %v422_v39  ;;  %v476_v9 = vmul.f32 %v1108_v50, %v470_v30  ;;  %v477_v23 = vmul.f32 %v475_v41, %v1673_v16  ;;  %v481_v26 = vadd.f32 %v475_v41, %v452_v0  ;;  %v2125_v8 = vld [vmem:[#allocation13_spill] sm:$0xff] }
 0x201   : > { %v743_v44 = vrot.slane %v1701_v5, 4  ;;  %v1792_v22 = vmul.f32 -18.0, %v632_v57  ;;  %v662_v51 = vsub.f32 %v1237_v14, %v1782_v43  ;;  %v1797_v4 = vsel %vm246_vm11, %v684_v36, %v685_v31 }
 0x202   : > { %v478_v63 = vmul.f32 %v476_v9, %v1677_v20  ;;  %v479_v62 = vadd.f32 %v477_v23, %v450_v3  ;;  %v482_v32 = vadd.f32 %v476_v9, %v453_v27  ;;  %v503_v37 = vadd.f32 %v2115_v52, %v481_v26  ;;  %v2126_v27 = vld [vmem:[#allocation11_spill] sm:$0xff]  ;;  %v1835_v9 = vpop.permute.xlu0 %771  ;;  %v2127_v23 = vld [vmem:[#allocation12_spill] sm:$0xff] }
 0x203   : > { %v587_v16 = vmul.f32 %v2117_v60, %v2116_v7  ;;  %v616_v2 = vmul.f32 %v2119_v40, %v2118_v35  ;;  %v1808_v47 = vsel %vm276_vm12, %v713_v21, %v714_v29  ;;  %v1813_v48 = vsel %vm306_vm13, %v742_v55, %v743_v44 }
 0x204   : > { %v480_v20 = vadd.f32 %v478_v63, %v451_v54  ;;  %v501_v28 = vadd.f32 %v2120_v38, %v479_v62  ;;  %v504_v49 = vadd.f32 %v2121_v59, %v482_v32  ;;  %v535_v10 = vadd.f32 %v2122_v45, %v503_v37 }
 0x205   : > { %1109 = vpow2.f32 %v642_v46  ;;  %v640_v33 = vmul.f32 1.442695, %v1792_v22  ;;  %v664_v30 = vmul.f32 %v662_v51, %v662_v51  ;;  %v691_v39 = vsub.f32 %v1237_v14, %v1797_v4 }
 0x206   : > { %v502_v11 = vadd.f32 %v2123_v53, %v480_v20  ;;  %v536_v0 = vadd.f32 %v1493_v17, %v504_v49  ;;  %v533_v57 = vadd.f32 %v2124_v1, %v501_v28  ;;  %v564_v36 = vadd.f32 %v1495_v18, %v535_v10  ;;  %v629_v18 = vpop.permute.xlu1 %628 }
 0x207   : > { %v619_v3 = vmul.f32 %v1752_v24, %v2125_v8  ;;  %v589_v41 = vmul.f32 %v587_v16, %v2126_v27  ;;  %v720_v46 = vsub.f32 %v1237_v14, %v1808_v47  ;;  %v749_v50 = vsub.f32 %v1237_v14, %v1813_v48 }
 0x208   : > { %v534_v21 = vadd.f32 %v1726_v13, %v502_v11  ;;  %v565_v55 = vadd.f32 %v1718_v19, %v536_v0  ;;  %v562_v17 = vadd.f32 %v1730_v56, %v533_v57  ;;  %v593_v54 = vadd.f32 %v587_v16, %v564_v36 }
 0x209   : > { %v618_v26 = vmul.f32 %v616_v2, %v2127_v23  ;;  %1111 = vpow2.f32 %v640_v33  ;;  %v666_v51 = vmul.f32 -18.0, %v664_v30  ;;  %v693_v63 = vmul.f32 %v691_v39, %v691_v39 }
 0x20a   : > { %v563_v62 = vadd.f32 %v1740_v6, %v534_v21  ;;  %v594_v32 = vadd.f32 %v1748_v25, %v565_v55  ;;  %v591_v52 = vadd.f32 %v589_v41, %v562_v17  ;;  %v1840_v37 = vadd.f32 %v616_v2, %v593_v54 }
 0x20b   : > { %v722_v13 = vmul.f32 %v720_v46, %v720_v46  ;;  %v777_v19 = vsub.f32 %v1237_v14, %v1835_v9  ;;  %v658_v56 = vrot.slane %v629_v18, 1  ;;  %v687_v7 = vrot.slane %v629_v18, 2 }
 0x20c   : > { %v592_v60 = vadd.f32 %v1774_v34, %v563_v62  ;;  %v1846_v16 = vadd.f32 %v1752_v24, %v594_v32  ;;  %v1848_v35 = vadd.f32 %v618_v26, %v591_v52  ;;  %v751_v40 = vmul.f32 %v749_v50, %v749_v50  ;;  %v1907_v62 = vpop.permute.xlu1 %773 }
 0x20d   : > { %v672_v6 = vmul.f32 1.442695, %v666_v51  ;;  %v1853_v25 = vsel %vm216_vm10, %v656_v61, %v658_v56  ;;  %v1856_v2 = vsel %vm246_vm11, %v685_v31, %v687_v7  ;;  %v716_v20 = vrot.slane %v629_v18, 3 }
 0x20e   : > { %v1858_v38 = vadd.f32 %v619_v3, %v592_v60  ;;  %vm637_vm4 = vcmp.lt.f32.partialorder %v1754_v42, -1.5659682  ;;  %v663_v24 = vsub.f32 %v1233_v15, %v1853_v25  ;;  %v695_v34 = vmul.f32 -18.0, %v693_v63  ;;  %v1905_v63 = vpop.permute.xlu0 %775 }
 0x20f   : > { %v779_v28 = vmul.f32 %v777_v19, %v777_v19  ;;  %v692_v59 = vsub.f32 %v1233_v15, %v1856_v2  ;;  %v724_v49 = vmul.f32 -18.0, %v722_v13  ;;  %v1868_v61 = vsel %vm276_vm12, %v714_v29, %v716_v20 }
 0x210   : > { %v665_v45 = vmul.f32 %v663_v24, %v663_v24  ;;  %v745_v31 = vrot.slane %v629_v18, 4  ;;  %v639_v10 = vsel %vm637_vm4, 0.1, %v2113_v58  ;;  %1113 = vpow2.f32 %v672_v6 }
 0x211   : > { %v753_v42 = vmul.f32 -18.0, %v751_v40  ;;  %v694_v39 = vmul.f32 %v692_v59, %v692_v59  ;;  %v721_v53 = vsub.f32 %v1233_v15, %v1868_v61  ;;  %vm636_vm5 = vcmp.lt.f32.partialorder %v1792_v22, -1.5659682 }
 0x212   : > { %v1110_v33 = vpop.eup %1109  ;;  %v1871_v30 = vmul.f32 -18.0, %v665_v45  ;;  %v1878_v11 = vsel %vm306_vm13, %v743_v44, %v745_v31  ;;  %v701_v29 = vmul.f32 1.442695, %v695_v34  ;;  %v1881_v0 = vmul.f32 -18.0, %v779_v28 }
 0x213   : > { %v750_v1 = vsub.f32 %v1233_v15, %v1878_v11  ;;  %v730_v57 = vmul.f32 1.442695, %v724_v49  ;;  %v1886_v8 = vmul.f32 -18.0, %v694_v39  ;;  %v723_v3 = vmul.f32 %v721_v53, %v721_v53 }
 0x214   : > { %v674_v36 = vmul.f32 1.442695, %v1871_v30  ;;  %v645_v27 = vmul.f32 %v1110_v33, %v639_v10  ;;  %vm668_vm6 = vcmp.lt.f32.partialorder %v666_v51, -1.5659682  ;;  %vm697_vm7 = vcmp.lt.f32.partialorder %v695_v34, -1.5659682 }
 0x215   : > { %v752_v41 = vmul.f32 %v750_v1, %v750_v1  ;;  %v759_v46 = vmul.f32 1.442695, %v753_v42  ;;  %v703_v50 = vmul.f32 1.442695, %v1886_v8  ;;  %v1889_v21 = vmul.f32 -18.0, %v723_v3 }
 0x216   : > { %v1112_v44 = vpop.eup %1111  ;;  %1115 = vpow2.f32 %v674_v36  ;;  %v638_v55 = vsel %vm636_vm5, 0.1, %v2113_v58  ;;  %vm726_vm8 = vcmp.lt.f32.partialorder %v724_v49, -1.5659682  ;;  %v787_v17 = vmul.f32 1.442695, %v1881_v0 }
 0x217   : > { %1117 = vpow2.f32 %v701_v29  ;;  %vm755_vm9 = vcmp.lt.f32.partialorder %v753_v42, -1.5659682  ;;  %v802_v54 = vrot.slane %v1835_v9, 1  ;;  %v732_v18 = vmul.f32 1.442695, %v1889_v21 }
 0x218   : > { %1119 = vpow2.f32 %v730_v57  ;;  %v670_v23 = vsel %vm668_vm6, 0.1, %v2113_v58  ;;  %v1901_v26 = vsel %vm697_vm7, 0.1, %v2113_v58  ;;  %v1903_v22 = vmul.f32 -18.0, %v752_v41 }
 0x219   : > { %1121 = vpow2.f32 %v703_v50  ;;  %v1910_v32 = vmul.f32 %v645_v27, %v1701_v5  ;;  %v1913_v52 = vsel %vm726_vm8, 0.1, %v2113_v58  ;;  %v831_v51 = vrot.slane %v1835_v9, 2 }
 0x21a   : > { %1123 = vpow2.f32 %v759_v46  ;;  %v644_v13 = vmul.f32 %v1112_v44, %v638_v55  ;;  %v1917_v19 = vsel %vm755_vm9, 0.1, %v2113_v58  ;;  %v860_v56 = vrot.slane %v1835_v9, 3 }
 0x21b   : > { %1125 = vpow2.f32 %v787_v17  ;;  %v805_v7 = vrot.slane %v1905_v63, 1  ;;  %v778_v5 = vsub.f32 %v1233_v15, %v1907_v62  ;;  %v803_v60 = vrot.slane %v1907_v62, 1 }
 0x21c   : > { %1127 = vpow2.f32 %v732_v18  ;;  %v761_v40 = vmul.f32 1.442695, %v1903_v22  ;;  %v834_v6 = vrot.slane %v1905_v63, 2  ;;  %v832_v20 = vrot.slane %v1907_v62, 2 }
 0x21d   : > { %v861_v24 = vrot.slane %v1907_v62, 3  ;;  %v1114_v34 = vpop.eup %1113  ;;  %v650_v28 = vadd.f32 %v644_v13, %v1840_v37  ;;  %v780_v59 = vmul.f32 %v778_v5, %v778_v5  ;;  %v1930_v49 = vsel %vm216_vm10, %v802_v54, %v803_v60 }
 0x21e   : > { %v1933_v45 = vsel %vm216_vm10, %v803_v60, %v805_v7  ;;  %v809_v31 = vsub.f32 %v1237_v14, %v1930_v49  ;;  %v1940_v42 = vsel %vm246_vm11, %v831_v51, %v832_v20  ;;  %v1943_v33 = vsel %vm246_vm11, %v832_v20, %v834_v6 }
 0x21f   : > { %v810_v10 = vsub.f32 %v1233_v15, %v1933_v45  ;;  %vm669_vm14 = vcmp.lt.f32.partialorder %v1871_v30, -1.5659682  ;;  %v1946_v37 = vmul.f32 -18.0, %v780_v59  ;;  %v838_v39 = vsub.f32 %v1237_v14, %v1940_v42 }
 0x220   : > { %v839_v53 = vsub.f32 %v1233_v15, %v1943_v33  ;;  %1129 = vpow2.f32 %v761_v40  ;;  %v811_v29 = vmul.f32 %v809_v31, %v809_v31  ;;  %v1953_v57 = vsel %vm276_vm12, %v860_v56, %v861_v24 }
 0x221   : > { %v812_v1 = vmul.f32 %v810_v10, %v810_v10  ;;  %v676_v36 = vmul.f32 %v1114_v34, %v670_v23  ;;  %v863_v3 = vrot.slane %v1905_v63, 3  ;;  %v789_v41 = vmul.f32 1.442695, %v1946_v37 }
 0x222   : > { %v840_v44 = vmul.f32 %v838_v39, %v838_v39  ;;  %v651_v50 = vadd.f32 %v645_v27, %v1846_v16  ;;  %v1958_v55 = vmul.f32 -18.0, %v811_v29  ;;  %v841_v54 = vmul.f32 %v839_v53, %v839_v53 }
 0x223   : > { %v1116_v46 = vpop.eup %1115  ;;  %v1960_v17 = vmul.f32 -18.0, %v812_v1  ;;  %v671_v51 = vsel %vm669_vm14, 0.1, %v2113_v58  ;;  %vm698_vm10 = vcmp.lt.f32.partialorder %v1886_v8, -1.5659682  ;;  %v1967_v23 = vsel %vm276_vm12, %v861_v24, %v863_v3 }
 0x224   : > { %v1118_v18 = vpop.eup %1117  ;;  %v867_v56 = vsub.f32 %v1237_v14, %v1953_v57  ;;  %v1971_v16 = vmul.f32 %v1116_v46, %v671_v51  ;;  %1131 = vpow2.f32 %v789_v41  ;;  %v819_v27 = vmul.f32 1.442695, %v1958_v55 }
 0x225   : > { %v1120_v7 = vpop.eup %1119  ;;  %v1974_v5 = vmul.f32 -18.0, %v840_v44  ;;  %v646_v30 = vmul.f32 %v644_v13, %v1743_v12  ;;  %v682_v40 = vadd.f32 %v676_v36, %v650_v28  ;;  %v889_v6 = vrot.slane %v1835_v9, 4 }
 0x226   : > { %v1122_v60 = vpop.eup %1121  ;;  %vm727_vm11 = vcmp.lt.f32.partialorder %v1889_v21, -1.5659682  ;;  %vm783_vm12 = vcmp.lt.f32.partialorder %v1881_v0, -1.5659682  ;;  %v683_v24 = vadd.f32 %v1971_v16, %v651_v50  ;;  %v821_v34 = vmul.f32 1.442695, %v1960_v17 }
 0x227   : > { %v1124_v20 = vpop.eup %1123  ;;  %v1982_v59 = vmul.f32 -18.0, %v841_v54  ;;  %v868_v31 = vsub.f32 %v1233_v15, %v1967_v23  ;;  %v705_v12 = vmul.f32 %v1118_v18, %v1901_v26  ;;  %v700_v13 = vsel %vm698_vm10, 0.1, %v2113_v58 }
 0x228   : > { %v1126_v10 = vpop.eup %1125  ;;  %1133 = vpow2.f32 %v819_v27  ;;  %v869_v28 = vmul.f32 %v867_v56, %v867_v56  ;;  %v706_v53 = vmul.f32 %v1122_v60, %v700_v13  ;;  %v848_v29 = vmul.f32 1.442695, %v1974_v5 }
 0x229   : > { %v1128_v39 = vpop.eup %1127  ;;  %1135 = vpow2.f32 %v821_v34  ;;  %v890_v1 = vrot.slane %v1907_v62, 4  ;;  %v648_v3 = vadd.f32 %v646_v30, %v1848_v35  ;;  %v711_v41 = vadd.f32 %v705_v12, %v682_v40 }
 0x22a   : > { %v1994_v44 = vmul.f32 %v1120_v7, %v1913_v52  ;;  %v729_v8 = vsel %vm727_vm11, 0.1, %v2113_v58  ;;  %v712_v26 = vadd.f32 %v706_v53, %v683_v24  ;;  %v892_v46 = vrot.slane %v1905_v63, 4 }
 0x22b   : > { %v850_v50 = vmul.f32 1.442695, %v1982_v59  ;;  %v870_v54 = vmul.f32 %v868_v31, %v868_v31  ;;  %v735_v18 = vmul.f32 %v1128_v39, %v729_v8  ;;  %vm756_vm15 = vcmp.lt.f32.partialorder %v1903_v22, -1.5659682 }
 0x22c   : > { %1137 = vpow2.f32 %v848_v29  ;;  %v2002_v51 = vmul.f32 -18.0, %v869_v28  ;;  %v2007_v52 = vsel %vm306_vm13, %v889_v6, %v890_v1  ;;  %v2010_v21 = vsel %vm306_vm13, %v890_v1, %v892_v46 }
 0x22d   : > { %1139 = vpow2.f32 %v850_v50  ;;  %v2004_v35 = vmul.f32 -18.0, %v870_v54  ;;  %v1130_v56 = vpop.eup %1129  ;;  %v678_v63 = vmul.f32 %v676_v36, %v1782_v43  ;;  %v740_v7 = vadd.f32 %v1994_v44, %v711_v41 }
 0x22e   : > { %v877_v27 = vmul.f32 1.442695, %v2002_v51  ;;  %v896_v60 = vsub.f32 %v1237_v14, %v2007_v52  ;;  %v649_v30 = vadd.f32 %v1910_v32, %v1858_v38  ;;  %v741_v40 = vadd.f32 %v735_v18, %v712_v26 }
 0x22f   : > { %v879_v6 = vmul.f32 1.442695, %v2004_v35  ;;  %v897_v24 = vsub.f32 %v1233_v15, %v2010_v21  ;;  %v763_v34 = vmul.f32 %v1124_v20, %v1917_v19  ;;  %v758_v43 = vsel %vm756_vm15, 0.1, %v2113_v58 }
 0x230   : > { %1141 = vpow2.f32 %v877_v27  ;;  %v898_v36 = vmul.f32 %v896_v60, %v896_v60  ;;  %v764_v31 = vmul.f32 %v1130_v56, %v758_v43  ;;  %vm784_vm13 = vcmp.lt.f32.partialorder %v1946_v37, -1.5659682 }
 0x231   : > { %1143 = vpow2.f32 %v879_v6  ;;  %v899_v14 = vmul.f32 %v897_v24, %v897_v24  ;;  %v1132_v38 = vpop.eup %1131  ;;  %v769_v32 = vadd.f32 %v763_v34, %v740_v7  ;;  %v785_v13 = vsel %vm783_vm12, 0.1, %v2113_v58 }
 0x232   : > { %v2030_v15 = vmul.f32 -18.0, %v898_v36  ;;  %v680_v19 = vadd.f32 %v678_v63, %v648_v3  ;;  %v679_v22 = vmul.f32 %v1971_v16, %v1853_v25  ;;  %v770_v20 = vadd.f32 %v764_v31, %v741_v40 }
 0x233   : > { %v901_v28 = vmul.f32 -18.0, %v899_v14  ;;  %v791_v39 = vmul.f32 %v1126_v10, %v785_v13  ;;  %v786_v29 = vsel %vm784_vm13, 0.1, %v2113_v58  ;;  %vm815_vm0 = vcmp.lt.f32.partialorder %v1958_v55, -1.5659682 }
 0x234   : > { %v906_v37 = vmul.f32 1.442695, %v2030_v15  ;;  %v681_v41 = vadd.f32 %v679_v22, %v649_v30  ;;  %v792_v8 = vmul.f32 %v1132_v38, %v786_v29  ;;  %vm816_vm1 = vcmp.lt.f32.partialorder %v1960_v17, -1.5659682 }
 0x235   : > { %v1134_v1 = vpop.eup %1133  ;;  %v908_v0 = vmul.f32 1.442695, %v901_v28  ;;  %v707_v3 = vmul.f32 %v705_v12, %v1797_v4  ;;  %v797_v46 = vadd.f32 %v791_v39, %v769_v32  ;;  %v708_v25 = vmul.f32 %v706_v53, %v1856_v2 }
 0x236   : > { %v1136_v26 = vpop.eup %1135  ;;  %1145 = vpow2.f32 %v906_v37  ;;  %v798_v16 = vadd.f32 %v792_v8, %v770_v20  ;;  %v817_v10 = vsel %vm815_vm0, 0.1, %v2113_v58  ;;  %v818_v50 = vsel %vm816_vm1, 0.1, %v2113_v58 }
 0x237   : > { %1147 = vpow2.f32 %v908_v0  ;;  %v709_v55 = vadd.f32 %v707_v3, %v680_v19  ;;  %v823_v54 = vmul.f32 %v1134_v1, %v817_v10  ;;  %vm844_vm2 = vcmp.lt.f32.partialorder %v1974_v5, -1.5659682 }
 0x238   : > { %v710_v17 = vadd.f32 %v708_v25, %v681_v41  ;;  %v824_v63 = vmul.f32 %v1136_v26, %v818_v50  ;;  %vm845_vm3 = vcmp.lt.f32.partialorder %v1982_v59, -1.5659682  ;;  %v736_v12 = vmul.f32 %v1994_v44, %v1808_v47 }
 0x239   : > { %v1138_v56 = vpop.eup %1137  ;;  %v829_v2 = vadd.f32 %v823_v54, %v797_v46  ;;  %v737_v53 = vmul.f32 %v735_v18, %v1868_v61  ;;  %v846_v27 = vsel %vm844_vm2, 0.1, %v2113_v58  ;;  %v847_v30 = vsel %vm845_vm3, 0.1, %v2113_v58 }
 0x23a   : > { %v1140_v4 = vpop.eup %1139  ;;  %v830_v7 = vadd.f32 %v824_v63, %v798_v16  ;;  %v738_v60 = vadd.f32 %v736_v12, %v709_v55  ;;  %v852_v40 = vmul.f32 %v1138_v56, %v846_v27  ;;  %vm873_vm4 = vcmp.lt.f32.partialorder %v2002_v51, -1.5659682 }
 0x23b   : > { %v739_v6 = vadd.f32 %v737_v53, %v710_v17  ;;  %v853_v24 = vmul.f32 %v1140_v4, %v847_v30  ;;  %vm874_vm5 = vcmp.lt.f32.partialorder %v2004_v35, -1.5659682  ;;  %v765_v47 = vmul.f32 %v763_v34, %v1813_v48 }
 0x23c   : > { %v858_v44 = vadd.f32 %v852_v40, %v829_v2  ;;  %v766_v61 = vmul.f32 %v764_v31, %v1878_v11  ;;  %v875_v43 = vsel %vm873_vm4, 0.1, %v2113_v58  ;;  %v876_v14 = vsel %vm874_vm5, 0.1, %v2113_v58 }
 0x23d   : > { %v1142_v5 = vpop.eup %1141  ;;  %v859_v18 = vadd.f32 %v853_v24, %v830_v7  ;;  %v767_v36 = vadd.f32 %v765_v47, %v738_v60  ;;  %vm902_vm6 = vcmp.lt.f32.partialorder %v2030_v15, -1.5659682  ;;  %vm903_vm7 = vcmp.lt.f32.partialorder %v901_v28, -1.5659682 }
 0x23e   : > { %v1144_v59 = vpop.eup %1143  ;;  %v881_v38 = vmul.f32 %v1142_v5, %v875_v43  ;;  %v768_v51 = vadd.f32 %v766_v61, %v739_v6  ;;  %v793_v35 = vmul.f32 %v791_v39, %v1835_v9  ;;  %v794_v48 = vmul.f32 %v792_v8, %v1907_v62 }
 0x23f   : > { %v882_v32 = vmul.f32 %v1144_v59, %v876_v14  ;;  %v904_v11 = vsel %vm902_vm6, 0.1, %v2113_v58  ;;  %v905_v20 = vsel %vm903_vm7, 0.1, %v2113_v58  ;;  %v825_v15 = vmul.f32 %v823_v54, %v1930_v49 }
 0x240   : > { %v887_v13 = vadd.f32 %v881_v38, %v858_v44  ;;  %v795_v22 = vadd.f32 %v793_v35, %v767_v36  ;;  %v796_v37 = vadd.f32 %v794_v48, %v768_v51  ;;  %v826_v28 = vmul.f32 %v824_v63, %v1933_v45 }
 0x241   : > { %v888_v34 = vadd.f32 %v882_v32, %v859_v18  ;;  %v854_v62 = vmul.f32 %v852_v40, %v1940_v42  ;;  %v855_v8 = vmul.f32 %v853_v24, %v1943_v33  ;;  %v883_v58 = vmul.f32 %v881_v38, %v1953_v57 }
 0x242   : > { %v827_v39 = vadd.f32 %v825_v15, %v795_v22  ;;  %v828_v0 = vadd.f32 %v826_v28, %v796_v37  ;;  %v884_v46 = vmul.f32 %v882_v32, %v1967_v23 }
 0x243   : > { %v1146_v19 = vpop.eup %1145 }
 0x244   : > { %v1148_v31 = vpop.eup %1147  ;;  %v910_v29 = vmul.f32 %v1146_v19, %v904_v11  ;;  %v856_v26 = vadd.f32 %v854_v62, %v827_v39  ;;  %v857_v3 = vadd.f32 %v855_v8, %v828_v0 }
 0x245   : > { %v911_v1 = vmul.f32 %v1148_v31, %v905_v20 }
 0x246   : > { %v916_v41 = vadd.f32 %v910_v29, %v887_v13  ;;  %v885_v25 = vadd.f32 %v883_v58, %v856_v26  ;;  %v886_v49 = vadd.f32 %v884_v46, %v857_v3  ;;  %v912_v16 = vmul.f32 %v910_v29, %v2007_v52 }
 0x247   : > { %v917_v9 = vadd.f32 %v911_v1, %v888_v34  ;;  %v913_v45 = vmul.f32 %v911_v1, %v2010_v21 }
 0x248   : > { %1149 = vrcp.f32 %v916_v41  ;;  %v914_v10 = vadd.f32 %v912_v16, %v885_v25 }
 0x249   : > { %1151 = vrcp.f32 %v917_v9  ;;  %v915_v50 = vadd.f32 %v913_v45, %v886_v49 }
 0x255   : > { %v1150_v55 = vpop.eup %1149  ;;  %67 = sbr.rel (!%p65_p5) target bundleno = 146 (0x92), region = 43 }
 0x256   : > { %v1152_v54 = vpop.eup %1151  ;;  %v919_v56 = vmul.f32 %v1150_v55, %v914_v10  }
 0x257   : > { %v921_v42 = vmul.f32 %v1152_v54, %v915_v50  }
 0x258   : > { %v2129_v14 = vmov %v919_v56  ;;  %922 = vst [vmem:[#allocation5 + $0x2] sm:$0xff] (%p65_p5), %v919_v56  ;;  %v925_v33 = vmul.f32 (%p65_p5), 1.9607843, %v919_v56 }
 0x259   : > { %v2128_v15 = vmov %v921_v42  ;;  %923 = vst [vmem:[#allocation5 + $0xa] sm:$0xff] (%p65_p5), %v921_v42  ;;  %v926_v57 = vmul.f32 (%p65_p5), 1.9607843, %v921_v42 }
 0x25a   :  { %v993_v23 = vcvt.f32.s32 %v925_v33 }
 0x25b   :  { %v996_v52 = vcvt.f32.s32 %v926_v57 }
 0x25c   :  { %1184 = shalt.err (!%p1181_p10)
}
 0x25d   :  { %942 = dma.vmem_to_hbm [thread:$0]  %s937_s6, 384, %s2088_s1, [#allocation4], %s1244_s12, %s1244_s12, %s1245_s13   ;;  %929 = vst [vmem:[#allocation6] sm:$0xff] %v993_v23  ;;  %930 = vst [vmem:[#allocation6 + $0x8] sm:$0xff] %v996_v52 }
 0x25e   :  { %s1193_s14 = scalar_lea.vmem %s949_s8, 256  ;;  %p1198_p12 = scmp.lt.s32.totalorder %s949_s8, %s949_s8 }
 0x25f   :  { %p1194_p11 = scmp.ne.s32.totalorder %s949_s8, %s1193_s14  ;;  %p1199_p13 = scmp.lt.s32.totalorder %s1193_s14, %s1193_s14 }
 0x261   :  { %p1200_p0 = por %p1199_p13, %p1198_p12 }
 0x263   :  { %p1201_p1 = pnand %p1200_p0, %p1194_p11 }
 0x265   :  { %1204 = shalt.err (!%p1201_p1)
}
 0x266   :  { %954 = dma.vmem_to_hbm [thread:$0]  %s949_s8, 256, %s2089_s2, [#allocation7], %s1244_s12, %s1244_s12, %s1245_s13  }
 0x267   :  { %1227 = dma.done.wait [#allocation4], 384  }
 0x268   :  { %1228 = vsyncadd [#allocation4], 4294966912 }
 0x269   :  { %1229 = dma.done.wait [#allocation7], 256  }
 0x26a   :  { %1230 = vsyncadd [#allocation7], 4294967040 }
 0x26b   :  { %961 = vsyncpa [#allocation3], 1 }
 0x26c   :  { %962 = vsyncpa [#allocation4], 1 }
 0x26d   :  { %963 = vsyncpa [#allocation7], 1 }

</bundles_post_ra>
